<compile_context>
chip_gen: v5e
topology: v5e:2x2
jax: 0.10.0
libtpu: 0.0.40
codegen_flags: <defaults>
</compile_context>

<pallas_src>
import jax
import jax.numpy as jnp
import numpy as np
from jax.experimental import pallas as pl
from jax.experimental.pallas import tpu as pltpu


def make_kernel(B, T, D, H, L):
    H2, H4, H6, H8 = 2 * H, 4 * H, 6 * H, 8 * H

    def kernel(len_ref, tgt_ref, x_ref,
               wih_ref, whh_ref, b_ref,
               wfc_ref, bfc_ref,
               loss_ref,
               gx_scr):
        lengths = len_ref[...]                                # [B, 1] int32 (read once)

        # ---- hoisted input projection: ONE matmul for all T steps & both directions ----
        # x_ref columns are [x_t | x_{T-1-t}], wih_ref is the fused [2D, 8H] weight,
        # bias for both directions folded into one [1, 8H] add.
        gx_scr[...] = (jnp.dot(x_ref[...], wih_ref[...],
                               preferred_element_type=jnp.float32)
                       + b_ref[...])                          # [T*B, 8H] f32

        # block-diagonal fused recurrent weight, loaded once, kept bf16 for the MXU
        whh = whh_ref[...]                                    # [2H, 8H] bf16

        # constant lane predicate: lanes [0:H) are the forward direction
        fwd_lane = jax.lax.broadcasted_iota(jnp.int32, (B, H2), 1) < H   # [B, 2H] bool

        # fused state: [h_fwd | h_bwd], [c_fwd | c_bwd] (kept in registers, f32)
        h = jnp.zeros((B, H2), jnp.float32)
        c = jnp.zeros((B, H2), jnp.float32)

        # static, fully-unrolled time loop; one dependent MXU matmul per step
        for t in range(T):
            gates = (gx_scr[pl.ds(t * B, B), :]
                     + jnp.dot(h.astype(jnp.bfloat16), whh,
                               preferred_element_type=jnp.float32))     # [B, 8H]
            # fused gate layout: [i_f i_b | f_f f_b | o_f o_b | g_f g_b]
            sig = jax.nn.sigmoid(gates[:, :H6])               # one sigmoid over [B, 6H]
            i_g = sig[:, :H2]
            f_g = sig[:, H2:H4]
            o_g = sig[:, H4:H6]
            g_g = jnp.tanh(gates[:, H6:])                     # one tanh over [B, 2H]
            c_new = f_g * c + i_g * g_g
            h_new = o_g * jnp.tanh(c_new)
            # per-direction time index: t for fwd lanes, T-1-t for bwd lanes
            t_eff = jnp.where(fwd_lane, t, T - 1 - t)         # [B, 2H] (constant per step)
            m = t_eff < lengths                               # [B, 2H] bool
            # boolean select reproduces pack_padded_sequence final-hidden semantics
            h = jnp.where(m, h_new, h)
            c = jnp.where(m, c_new, c)

        # ---- FC + cross entropy ----
        # fused state tile is already [h_fwd | h_bwd] == torch.cat((hn[0], hn[1]), -1)
        logits = (jnp.dot(h, wfc_ref[...],
                          preferred_element_type=jnp.float32)
                  + bfc_ref[...])                             # [B, L]
        tgt = tgt_ref[...]                                    # [B, 1] int32
        cls = jax.lax.broadcasted_iota(jnp.int32, (B, L), 1)
        onehot = (cls == tgt).astype(jnp.float32)             # [B, L]
        mx = jnp.max(logits, axis=-1, keepdims=True)
        lse = mx + jnp.log(jnp.sum(jnp.exp(logits - mx), axis=-1, keepdims=True))
        picked = jnp.sum(logits * onehot, axis=-1, keepdims=True)
        nll = lse - picked                                    # [B, 1]
        loss_ref[...] = (jnp.sum(nll) * (1.0 / float(B))).reshape(1, 1)

    return kernel


def binary_classifier_loss(src_tokens, src_lengths, target, params):
    """Pallas forward pass of binary_classifer.forward (returns scalar loss)."""
    emb, wih_f, whh_f, b_f, wih_b, whh_b, b_b, wfc, bfc = params
    B, T = src_tokens.shape
    D = emb.shape[1]
    H = whh_f.shape[1]
    L = wfc.shape[0]

    # Embedding lookup (glue, plain JAX) directly into time-major layout;
    # padding_idx=0 row is zero.
    x_tbd = jnp.take(emb, src_tokens.T, axis=0)               # [T, B, D]
    x_rev = x_tbd[::-1]                                       # time-reversed (bwd dir)
    x_fused = jnp.concatenate([x_tbd, x_rev], axis=-1)        # [T, B, 2D]
    x_fused = x_fused.reshape(T * B, 2 * D).astype(jnp.bfloat16)

    # -------- wrapper-side layout plumbing (done once, no in-kernel transposes) --------
    # PyTorch gate order per direction is [i, f, g, o].
    # Fused gate-column layout (blocks of H): [i_f, i_b, f_f, f_b, o_f, o_b, g_f, g_b].
    wif, wff, wgf, wof = jnp.split(wih_f, 4, axis=0)          # each [H, D]
    wib, wfb, wgb, wob = jnp.split(wih_b, 4, axis=0)
    ZD = jnp.zeros((D, H), jnp.float32)
    wih_top = jnp.concatenate([wif.T, ZD, wff.T, ZD, wof.T, ZD, wgf.T, ZD], axis=1)
    wih_bot = jnp.concatenate([ZD, wib.T, ZD, wfb.T, ZD, wob.T, ZD, wgb.T], axis=1)
    wih_fused = jnp.concatenate([wih_top, wih_bot], axis=0).astype(jnp.bfloat16)  # [2D, 8H]

    uif, uff, ugf, uof = jnp.split(whh_f, 4, axis=0)          # each [H, H]
    uib, ufb, ugb, uob = jnp.split(whh_b, 4, axis=0)
    ZH = jnp.zeros((H, H), jnp.float32)
    whh_top = jnp.concatenate([uif.T, ZH, uff.T, ZH, uof.T, ZH, ugf.T, ZH], axis=1)
    whh_bot = jnp.concatenate([ZH, uib.T, ZH, ufb.T, ZH, uob.T, ZH, ugb.T], axis=1)
    whh_fused = jnp.concatenate([whh_top, whh_bot], axis=0).astype(jnp.bfloat16)  # [2H, 8H]

    # NOTE: b_f / b_b must already be (b_ih + b_hh) per direction when importing
    # real PyTorch parameters.
    bif, bff, bgf, bof = jnp.split(b_f, 4, axis=1)            # each [1, H]
    bib, bfb, bgb, bob = jnp.split(b_b, 4, axis=1)
    b_fused = jnp.concatenate([bif, bib, bff, bfb, bof, bob, bgf, bgb], axis=1)  # [1, 8H]

    wfc_k = wfc.T                                             # [2H, L]

    lengths2 = src_lengths.astype(jnp.int32).reshape(B, 1)
    target2 = target.astype(jnp.int32).reshape(B, 1)

    kernel = make_kernel(B, T, D, H, L)

    def full(shape):
        return pl.BlockSpec(shape, lambda i, _s=shape: (0,) * len(_s))

    loss = pl.pallas_call(
        kernel,
        out_shape=jax.ShapeDtypeStruct((1, 1), jnp.float32),
        grid_spec=pltpu.PrefetchScalarGridSpec(
            num_scalar_prefetch=0,
            grid=(1,),
            in_specs=[
                full((B, 1)),                # lengths
                full((B, 1)),                # target
                full((T * B, 2 * D)),        # fused time-major embeddings [x_t | x_{T-1-t}]
                full((2 * D, 8 * H)),        # fused input-projection weight (bf16)
                full((2 * H, 8 * H)),        # block-diagonal recurrent weight (bf16)
                full((1, 8 * H)),            # fused bias (both directions)
                full((2 * H, L)),            # fc weight (pre-transposed)
                full((1, L)),                # fc bias
            ],
            out_specs=full((1, 1)),
            scratch_shapes=[pltpu.VMEM((T * B, 8 * H), jnp.float32)],  # single gx scratch
        ),
        compiler_params=pltpu.CompilerParams(
            dimension_semantics=("arbitrary",)),
    )(lengths2, target2, x_fused, wih_fused, whh_fused, b_fused, wfc_k, bfc)
    return loss[0, 0]


def reference_loss(src_tokens, src_lengths, target, params):
    """Pure-JAX reference (masked bidirectional LSTM + FC + CE)."""
    emb, wih_f, whh_f, b_f, wih_b, whh_b, b_b, wfc, bfc = params
    B, T = src_tokens.shape
    H = whh_f.shape[1]
    x = jnp.take(emb, src_tokens, axis=0)                     # [B, T, D]

    def run_dir(wih, whh, b, reverse):
        def step(carry, inp):
            h, c = carry
            x_t, m = inp
            gates = x_t @ wih.T + h @ whh.T + b
            i = jax.nn.sigmoid(gates[:, :H])
            f = jax.nn.sigmoid(gates[:, H:2 * H])
            g = jnp.tanh(gates[:, 2 * H:3 * H])
            o = jax.nn.sigmoid(gates[:, 3 * H:])
            c_new = f * c + i * g
            h_new = o * jnp.tanh(c_new)
            h = m * h_new + (1 - m) * h
            c = m * c_new + (1 - m) * c
            return (h, c), None

        mask = (jnp.arange(T)[None, :] < src_lengths[:, None]).astype(jnp.float32)
        xs = jnp.transpose(x, (1, 0, 2))                      # [T, B, D]
        ms = mask.T[:, :, None]                               # [T, B, 1]
        if reverse:
            xs, ms = xs[::-1], ms[::-1]
        (h, _), _ = jax.lax.scan(step, (jnp.zeros((B, H)), jnp.zeros((B, H))), (xs, ms))
        return h

    hf = run_dir(wih_f, whh_f, b_f[0], reverse=False)
    hb = run_dir(wih_b, whh_b, b_b[0], reverse=True)
    hidden = jnp.concatenate([hf, hb], axis=-1)
    logits = hidden @ wfc.T + bfc[0]
    lse = jax.scipy.special.logsumexp(logits, axis=-1)
    nll = lse - jnp.take_along_axis(logits, target[:, None], axis=-1)[:, 0]
    return jnp.mean(nll)


if __name__ == "__main__":
    # small synthetic config consistent with the module's __init__
    VOCAB = 50          # len(vocab)
    B = 8               # batch
    T = 10              # args.src_max_time_step
    D = 16              # args.enc_embed_dim
    H = 32              # args.enc_hidden_dim  (bidirectional -> enc_dim = 64)
    L = 2               # args.label_num

    key = jax.random.PRNGKey(0)
    ks = jax.random.split(key, 12)

    # deterministic "parameters" (PyTorch-style layouts; wrapper re-layouts for the kernel)
    emb = 0.1 * jax.random.normal(ks[0], (VOCAB, D), jnp.float32)
    emb = emb.at[0].set(0.0)                                  # padding_idx=0
    wih_f = 0.1 * jax.random.normal(ks[1], (4 * H, D), jnp.float32)
    whh_f = 0.1 * jax.random.normal(ks[2], (4 * H, H), jnp.float32)
    b_f = 0.1 * jax.random.normal(ks[3], (1, 4 * H), jnp.float32)   # b_ih + b_hh combined
    wih_b = 0.1 * jax.random.normal(ks[4], (4 * H, D), jnp.float32)
    whh_b = 0.1 * jax.random.normal(ks[5], (4 * H, H), jnp.float32)
    b_b = 0.1 * jax.random.normal(ks[6], (1, 4 * H), jnp.float32)
    wfc = 0.1 * jax.random.normal(ks[7], (L, 2 * H), jnp.float32)
    bfc = 0.1 * jax.random.normal(ks[8], (1, L), jnp.float32)
    params = (emb, wih_f, whh_f, b_f, wih_b, whh_b, b_b, wfc, bfc)

    # deterministic inputs (the dict in forward(): 'src tensor', 'src lengths', 'target')
    src_lengths = jax.random.randint(ks[9], (B,), 3, T + 1).astype(jnp.int32)
    tok = jax.random.randint(ks[10], (B, T), 1, VOCAB).astype(jnp.int32)
    pad_mask = jnp.arange(T)[None, :] < src_lengths[:, None]
    src_tokens = jnp.where(pad_mask, tok, 0)                  # pad with id 0
    target = jax.random.randint(ks[11], (B,), 0, L).astype(jnp.int32)

    loss = binary_classifier_loss(src_tokens, src_lengths, target, params)
    loss = jax.block_until_ready(loss)

    ref = jax.block_until_ready(reference_loss(src_tokens, src_lengths, target, params))
    np.testing.assert_allclose(np.asarray(loss), np.asarray(ref), rtol=1e-2, atol=1e-2)

    print("KERNEL_OK")
</pallas_src>

<mosaic_0001>
module attributes {stable_mosaic.version = 11 : i64} {
  func.func @kernel(%arg0: i32, %arg1: memref<8x1xi32, #tpu.memory_space<vmem>>, %arg2: memref<8x1xi32, #tpu.memory_space<vmem>>, %arg3: memref<80x32xbf16, #tpu.memory_space<vmem>>, %arg4: memref<32x256xbf16, #tpu.memory_space<vmem>>, %arg5: memref<64x256xbf16, #tpu.memory_space<vmem>>, %arg6: memref<1x256xf32, #tpu.memory_space<vmem>>, %arg7: memref<64x2xf32, #tpu.memory_space<vmem>>, %arg8: memref<1x2xf32, #tpu.memory_space<vmem>>, %arg9: memref<1x1xf32, #tpu.memory_space<vmem>>, %arg10: memref<80x256xf32, #tpu.memory_space<vmem>>) attributes {dimension_semantics = [#tpu.dimension_semantics<arbitrary>], iteration_bounds = array<i64: 1>, scalar_prefetch = 0 : i64, scratch_operands = 1 : i64, tpu.core_type = #tpu.core_type<tc>, window_params = [{pipeline_mode = #tpu.pipeline_mode<synchronous>, transform_indices = @transform_0, window_bounds = array<i64: 8, 1>}, {pipeline_mode = #tpu.pipeline_mode<synchronous>, transform_indices = @transform_1, window_bounds = array<i64: 8, 1>}, {pipeline_mode = #tpu.pipeline_mode<synchronous>, transform_indices = @transform_2, window_bounds = array<i64: 80, 32>}, {pipeline_mode = #tpu.pipeline_mode<synchronous>, transform_indices = @transform_3, window_bounds = array<i64: 32, 256>}, {pipeline_mode = #tpu.pipeline_mode<synchronous>, transform_indices = @transform_4, window_bounds = array<i64: 64, 256>}, {pipeline_mode = #tpu.pipeline_mode<synchronous>, transform_indices = @transform_5, window_bounds = array<i64: 1, 256>}, {pipeline_mode = #tpu.pipeline_mode<synchronous>, transform_indices = @transform_6, window_bounds = array<i64: 64, 2>}, {pipeline_mode = #tpu.pipeline_mode<synchronous>, transform_indices = @transform_7, window_bounds = array<i64: 1, 2>}, {pipeline_mode = #tpu.pipeline_mode<synchronous>, transform_indices = @transform_8, window_bounds = array<i64: 1, 1>}]} {
    %c0 = arith.constant 0 : index
    %c0_0 = arith.constant 0 : index
    %0 = vector.load %arg1[%c0, %c0_0] : memref<8x1xi32, #tpu.memory_space<vmem>>, vector<8x1xi32>
    %c0_1 = arith.constant 0 : index
    %c0_2 = arith.constant 0 : index
    %1 = vector.load %arg3[%c0_1, %c0_2] : memref<80x32xbf16, #tpu.memory_space<vmem>>, vector<80x32xbf16>
    %c0_3 = arith.constant 0 : index
    %c0_4 = arith.constant 0 : index
    %2 = vector.load %arg4[%c0_3, %c0_4] : memref<32x256xbf16, #tpu.memory_space<vmem>>, vector<32x256xbf16>
    %cst = arith.constant dense<0.000000e+00> : vector<80x256xf32>
    %3 = tpu.matmul %1, %2, %cst {dimension_numbers = #tpu.dot_dimension_numbers<[1], [0], [0], [1], [0, 0, 1, 1], [], []>} : vector<80x32xbf16>, vector<32x256xbf16>, vector<80x256xf32> -> vector<80x256xf32>
    %c0_5 = arith.constant 0 : index
    %c0_6 = arith.constant 0 : index
    %4 = vector.load %arg6[%c0_5, %c0_6] : memref<1x256xf32, #tpu.memory_space<vmem>>, vector<1x256xf32>
    %5 = vector.broadcast %4 : vector<1x256xf32> to vector<80x256xf32>
    %6 = arith.addf %3, %5 : vector<80x256xf32>
    %c0_7 = arith.constant 0 : index
    %c0_8 = arith.constant 0 : index
    %7 = vector.load %arg10[%c0_7, %c0_8] : memref<80x256xf32, #tpu.memory_space<vmem>>, vector<80x256xf32>
    tpu.vector_store %arg10[%c0_7, %c0_8], %6 {strides = array<i32>} : memref<80x256xf32, #tpu.memory_space<vmem>>, vector<80x256xf32>,
    %c0_9 = arith.constant 0 : index
    %c0_10 = arith.constant 0 : index
    %8 = vector.load %arg5[%c0_9, %c0_10] : memref<64x256xbf16, #tpu.memory_space<vmem>>, vector<64x256xbf16>
    %9 = tpu.iota {dimensions = array<i32: 1>} : vector<8x64xi32>
    %c32_i32 = arith.constant 32 : i32
    %10 = vector.broadcast %c32_i32 : i32 to vector<8x64xi32>
    %11 = arith.cmpi slt, %9, %10 : vector<8x64xi32>
    %cst_11 = arith.constant 0.000000e+00 : f32
    %12 = vector.broadcast %cst_11 : f32 to vector<8x64xf32>
    %cst_12 = arith.constant 0.000000e+00 : f32
    %13 = vector.broadcast %cst_12 : f32 to vector<8x64xf32>
    %c0_13 = arith.constant 0 : index
    %c0_14 = arith.constant 0 : index
    %14 = vector.load %arg10[%c0_13, %c0_14] : memref<80x256xf32, #tpu.memory_space<vmem>>, vector<8x256xf32>
    %15 = arith.truncf %12 : vector<8x64xf32> to vector<8x64xbf16>
    %cst_15 = arith.constant dense<0.000000e+00> : vector<8x256xf32>
    %16 = tpu.matmul %15, %8, %cst_15 {dimension_numbers = #tpu.dot_dimension_numbers<[1], [0], [0], [1], [0, 0, 1, 1], [], []>} : vector<8x64xbf16>, vector<64x256xbf16>, vector<8x256xf32> -> vector<8x256xf32>
    %17 = arith.addf %14, %16 : vector<8x256xf32>
    %18 = vector.extract_strided_slice %17 {offsets = [0, 0], sizes = [8, 192], strides = [1, 1]} : vector<8x256xf32> to vector<8x192xf32>
    %19 = arith.negf %18 : vector<8x192xf32>
    %20 = math.exp %19 : vector<8x192xf32>
    %cst_16 = arith.constant 1.000000e+00 : f32
    %21 = vector.broadcast %cst_16 : f32 to vector<8x192xf32>
    %22 = arith.addf %21, %20 : vector<8x192xf32>
    %23 = arith.divf %21, %22 : vector<8x192xf32>
    %24 = vector.extract_strided_slice %23 {offsets = [0, 0], sizes = [8, 64], strides = [1, 1]} : vector<8x192xf32> to vector<8x64xf32>
    %25 = vector.extract_strided_slice %23 {offsets = [0, 64], sizes = [8, 64], strides = [1, 1]} : vector<8x192xf32> to vector<8x64xf32>
    %26 = vector.extract_strided_slice %23 {offsets = [0, 128], sizes = [8, 64], strides = [1, 1]} : vector<8x192xf32> to vector<8x64xf32>
    %27 = vector.extract_strided_slice %17 {offsets = [0, 192], sizes = [8, 64], strides = [1, 1]} : vector<8x256xf32> to vector<8x64xf32>
    %28 = math.tanh %27 : vector<8x64xf32>
    %29 = arith.mulf %25, %13 : vector<8x64xf32>
    %30 = arith.mulf %24, %28 : vector<8x64xf32>
    %31 = arith.addf %29, %30 : vector<8x64xf32>
    %32 = math.tanh %31 : vector<8x64xf32>
    %33 = arith.mulf %26, %32 : vector<8x64xf32>
    %c0_i32 = arith.constant 0 : i32
    %c9_i32 = arith.constant 9 : i32
    %34 = vector.broadcast %c0_i32 : i32 to vector<8x64xi32>
    %35 = vector.broadcast %c9_i32 : i32 to vector<8x64xi32>
    %36 = arith.select %11, %34, %35 : vector<8x64xi1>, vector<8x64xi32>
    %37 = vector.broadcast %0 : vector<8x1xi32> to vector<8x64xi32>
    %38 = arith.cmpi slt, %36, %37 : vector<8x64xi32>
    %39 = arith.select %38, %33, %12 : vector<8x64xi1>, vector<8x64xf32>
    %40 = arith.select %38, %31, %13 : vector<8x64xi1>, vector<8x64xf32>
    %c8 = arith.constant 8 : index
    %c0_17 = arith.constant 0 : index
    %41 = vector.load %arg10[%c8, %c0_17] : memref<80x256xf32, #tpu.memory_space<vmem>>, vector<8x256xf32>
    %42 = arith.truncf %39 : vector<8x64xf32> to vector<8x64xbf16>
    %cst_18 = arith.constant dense<0.000000e+00> : vector<8x256xf32>
    %43 = tpu.matmul %42, %8, %cst_18 {dimension_numbers = #tpu.dot_dimension_numbers<[1], [0], [0], [1], [0, 0, 1, 1], [], []>} : vector<8x64xbf16>, vector<64x256xbf16>, vector<8x256xf32> -> vector<8x256xf32>
    %44 = arith.addf %41, %43 : vector<8x256xf32>
    %45 = vector.extract_strided_slice %44 {offsets = [0, 0], sizes = [8, 192], strides = [1, 1]} : vector<8x256xf32> to vector<8x192xf32>
    %46 = arith.negf %45 : vector<8x192xf32>
    %47 = math.exp %46 : vector<8x192xf32>
    %cst_19 = arith.constant 1.000000e+00 : f32
    %48 = vector.broadcast %cst_19 : f32 to vector<8x192xf32>
    %49 = arith.addf %48, %47 : vector<8x192xf32>
    %50 = arith.divf %48, %49 : vector<8x192xf32>
    %51 = vector.extract_strided_slice %50 {offsets = [0, 0], sizes = [8, 64], strides = [1, 1]} : vector<8x192xf32> to vector<8x64xf32>
    %52 = vector.extract_strided_slice %50 {offsets = [0, 64], sizes = [8, 64], strides = [1, 1]} : vector<8x192xf32> to vector<8x64xf32>
    %53 = vector.extract_strided_slice %50 {offsets = [0, 128], sizes = [8, 64], strides = [1, 1]} : vector<8x192xf32> to vector<8x64xf32>
    %54 = vector.extract_strided_slice %44 {offsets = [0, 192], sizes = [8, 64], strides = [1, 1]} : vector<8x256xf32> to vector<8x64xf32>
    %55 = math.tanh %54 : vector<8x64xf32>
    %56 = arith.mulf %52, %40 : vector<8x64xf32>
    %57 = arith.mulf %51, %55 : vector<8x64xf32>
    %58 = arith.addf %56, %57 : vector<8x64xf32>
    %59 = math.tanh %58 : vector<8x64xf32>
    %60 = arith.mulf %53, %59 : vector<8x64xf32>
    %c1_i32 = arith.constant 1 : i32
    %c8_i32 = arith.constant 8 : i32
    %61 = vector.broadcast %c1_i32 : i32 to vector<8x64xi32>
    %62 = vector.broadcast %c8_i32 : i32 to vector<8x64xi32>
    %63 = arith.select %11, %61, %62 : vector<8x64xi1>, vector<8x64xi32>
    %64 = vector.broadcast %0 : vector<8x1xi32> to vector<8x64xi32>
    %65 = arith.cmpi slt, %63, %64 : vector<8x64xi32>
    %66 = arith.select %65, %60, %39 : vector<8x64xi1>, vector<8x64xf32>
    %67 = arith.select %65, %58, %40 : vector<8x64xi1>, vector<8x64xf32>
    %c16 = arith.constant 16 : index
    %c0_20 = arith.constant 0 : index
    %68 = vector.load %arg10[%c16, %c0_20] : memref<80x256xf32, #tpu.memory_space<vmem>>, vector<8x256xf32>
    %69 = arith.truncf %66 : vector<8x64xf32> to vector<8x64xbf16>
    %cst_21 = arith.constant dense<0.000000e+00> : vector<8x256xf32>
    %70 = tpu.matmul %69, %8, %cst_21 {dimension_numbers = #tpu.dot_dimension_numbers<[1], [0], [0], [1], [0, 0, 1, 1], [], []>} : vector<8x64xbf16>, vector<64x256xbf16>, vector<8x256xf32> -> vector<8x256xf32>
    %71 = arith.addf %68, %70 : vector<8x256xf32>
    %72 = vector.extract_strided_slice %71 {offsets = [0, 0], sizes = [8, 192], strides = [1, 1]} : vector<8x256xf32> to vector<8x192xf32>
    %73 = arith.negf %72 : vector<8x192xf32>
    %74 = math.exp %73 : vector<8x192xf32>
    %cst_22 = arith.constant 1.000000e+00 : f32
    %75 = vector.broadcast %cst_22 : f32 to vector<8x192xf32>
    %76 = arith.addf %75, %74 : vector<8x192xf32>
    %77 = arith.divf %75, %76 : vector<8x192xf32>
    %78 = vector.extract_strided_slice %77 {offsets = [0, 0], sizes = [8, 64], strides = [1, 1]} : vector<8x192xf32> to vector<8x64xf32>
    %79 = vector.extract_strided_slice %77 {offsets = [0, 64], sizes = [8, 64], strides = [1, 1]} : vector<8x192xf32> to vector<8x64xf32>
    %80 = vector.extract_strided_slice %77 {offsets = [0, 128], sizes = [8, 64], strides = [1, 1]} : vector<8x192xf32> to vector<8x64xf32>
    %81 = vector.extract_strided_slice %71 {offsets = [0, 192], sizes = [8, 64], strides = [1, 1]} : vector<8x256xf32> to vector<8x64xf32>
    %82 = math.tanh %81 : vector<8x64xf32>
    %83 = arith.mulf %79, %67 : vector<8x64xf32>
    %84 = arith.mulf %78, %82 : vector<8x64xf32>
    %85 = arith.addf %83, %84 : vector<8x64xf32>
    %86 = math.tanh %85 : vector<8x64xf32>
    %87 = arith.mulf %80, %86 : vector<8x64xf32>
    %c2_i32 = arith.constant 2 : i32
    %c7_i32 = arith.constant 7 : i32
    %88 = vector.broadcast %c2_i32 : i32 to vector<8x64xi32>
    %89 = vector.broadcast %c7_i32 : i32 to vector<8x64xi32>
    %90 = arith.select %11, %88, %89 : vector<8x64xi1>, vector<8x64xi32>
    %91 = vector.broadcast %0 : vector<8x1xi32> to vector<8x64xi32>
    %92 = arith.cmpi slt, %90, %91 : vector<8x64xi32>
    %93 = arith.select %92, %87, %66 : vector<8x64xi1>, vector<8x64xf32>
    %94 = arith.select %92, %85, %67 : vector<8x64xi1>, vector<8x64xf32>
    %c24 = arith.constant 24 : index
    %c0_23 = arith.constant 0 : index
    %95 = vector.load %arg10[%c24, %c0_23] : memref<80x256xf32, #tpu.memory_space<vmem>>, vector<8x256xf32>
    %96 = arith.truncf %93 : vector<8x64xf32> to vector<8x64xbf16>
    %cst_24 = arith.constant dense<0.000000e+00> : vector<8x256xf32>
    %97 = tpu.matmul %96, %8, %cst_24 {dimension_numbers = #tpu.dot_dimension_numbers<[1], [0], [0], [1], [0, 0, 1, 1], [], []>} : vector<8x64xbf16>, vector<64x256xbf16>, vector<8x256xf32> -> vector<8x256xf32>
    %98 = arith.addf %95, %97 : vector<8x256xf32>
    %99 = vector.extract_strided_slice %98 {offsets = [0, 0], sizes = [8, 192], strides = [1, 1]} : vector<8x256xf32> to vector<8x192xf32>
    %100 = arith.negf %99 : vector<8x192xf32>
    %101 = math.exp %100 : vector<8x192xf32>
    %cst_25 = arith.constant 1.000000e+00 : f32
    %102 = vector.broadcast %cst_25 : f32 to vector<8x192xf32>
    %103 = arith.addf %102, %101 : vector<8x192xf32>
    %104 = arith.divf %102, %103 : vector<8x192xf32>
    %105 = vector.extract_strided_slice %104 {offsets = [0, 0], sizes = [8, 64], strides = [1, 1]} : vector<8x192xf32> to vector<8x64xf32>
    %106 = vector.extract_strided_slice %104 {offsets = [0, 64], sizes = [8, 64], strides = [1, 1]} : vector<8x192xf32> to vector<8x64xf32>
    %107 = vector.extract_strided_slice %104 {offsets = [0, 128], sizes = [8, 64], strides = [1, 1]} : vector<8x192xf32> to vector<8x64xf32>
    %108 = vector.extract_strided_slice %98 {offsets = [0, 192], sizes = [8, 64], strides = [1, 1]} : vector<8x256xf32> to vector<8x64xf32>
    %109 = math.tanh %108 : vector<8x64xf32>
    %110 = arith.mulf %106, %94 : vector<8x64xf32>
    %111 = arith.mulf %105, %109 : vector<8x64xf32>
    %112 = arith.addf %110, %111 : vector<8x64xf32>
    %113 = math.tanh %112 : vector<8x64xf32>
    %114 = arith.mulf %107, %113 : vector<8x64xf32>
    %c3_i32 = arith.constant 3 : i32
    %c6_i32 = arith.constant 6 : i32
    %115 = vector.broadcast %c3_i32 : i32 to vector<8x64xi32>
    %116 = vector.broadcast %c6_i32 : i32 to vector<8x64xi32>
    %117 = arith.select %11, %115, %116 : vector<8x64xi1>, vector<8x64xi32>
    %118 = vector.broadcast %0 : vector<8x1xi32> to vector<8x64xi32>
    %119 = arith.cmpi slt, %117, %118 : vector<8x64xi32>
    %120 = arith.select %119, %114, %93 : vector<8x64xi1>, vector<8x64xf32>
    %121 = arith.select %119, %112, %94 : vector<8x64xi1>, vector<8x64xf32>
    %c32 = arith.constant 32 : index
    %c0_26 = arith.constant 0 : index
    %122 = vector.load %arg10[%c32, %c0_26] : memref<80x256xf32, #tpu.memory_space<vmem>>, vector<8x256xf32>
    %123 = arith.truncf %120 : vector<8x64xf32> to vector<8x64xbf16>
    %cst_27 = arith.constant dense<0.000000e+00> : vector<8x256xf32>
    %124 = tpu.matmul %123, %8, %cst_27 {dimension_numbers = #tpu.dot_dimension_numbers<[1], [0], [0], [1], [0, 0, 1, 1], [], []>} : vector<8x64xbf16>, vector<64x256xbf16>, vector<8x256xf32> -> vector<8x256xf32>
    %125 = arith.addf %122, %124 : vector<8x256xf32>
    %126 = vector.extract_strided_slice %125 {offsets = [0, 0], sizes = [8, 192], strides = [1, 1]} : vector<8x256xf32> to vector<8x192xf32>
    %127 = arith.negf %126 : vector<8x192xf32>
    %128 = math.exp %127 : vector<8x192xf32>
    %cst_28 = arith.constant 1.000000e+00 : f32
    %129 = vector.broadcast %cst_28 : f32 to vector<8x192xf32>
    %130 = arith.addf %129, %128 : vector<8x192xf32>
    %131 = arith.divf %129, %130 : vector<8x192xf32>
    %132 = vector.extract_strided_slice %131 {offsets = [0, 0], sizes = [8, 64], strides = [1, 1]} : vector<8x192xf32> to vector<8x64xf32>
    %133 = vector.extract_strided_slice %131 {offsets = [0, 64], sizes = [8, 64], strides = [1, 1]} : vector<8x192xf32> to vector<8x64xf32>
    %134 = vector.extract_strided_slice %131 {offsets = [0, 128], sizes = [8, 64], strides = [1, 1]} : vector<8x192xf32> to vector<8x64xf32>
    %135 = vector.extract_strided_slice %125 {offsets = [0, 192], sizes = [8, 64], strides = [1, 1]} : vector<8x256xf32> to vector<8x64xf32>
    %136 = math.tanh %135 : vector<8x64xf32>
    %137 = arith.mulf %133, %121 : vector<8x64xf32>
    %138 = arith.mulf %132, %136 : vector<8x64xf32>
    %139 = arith.addf %137, %138 : vector<8x64xf32>
    %140 = math.tanh %139 : vector<8x64xf32>
    %141 = arith.mulf %134, %140 : vector<8x64xf32>
    %c4_i32 = arith.constant 4 : i32
    %c5_i32 = arith.constant 5 : i32
    %142 = vector.broadcast %c4_i32 : i32 to vector<8x64xi32>
    %143 = vector.broadcast %c5_i32 : i32 to vector<8x64xi32>
    %144 = arith.select %11, %142, %143 : vector<8x64xi1>, vector<8x64xi32>
    %145 = vector.broadcast %0 : vector<8x1xi32> to vector<8x64xi32>
    %146 = arith.cmpi slt, %144, %145 : vector<8x64xi32>
    %147 = arith.select %146, %141, %120 : vector<8x64xi1>, vector<8x64xf32>
    %148 = arith.select %146, %139, %121 : vector<8x64xi1>, vector<8x64xf32>
    %c40 = arith.constant 40 : index
    %c0_29 = arith.constant 0 : index
    %149 = vector.load %arg10[%c40, %c0_29] : memref<80x256xf32, #tpu.memory_space<vmem>>, vector<8x256xf32>
    %150 = arith.truncf %147 : vector<8x64xf32> to vector<8x64xbf16>
    %cst_30 = arith.constant dense<0.000000e+00> : vector<8x256xf32>
    %151 = tpu.matmul %150, %8, %cst_30 {dimension_numbers = #tpu.dot_dimension_numbers<[1], [0], [0], [1], [0, 0, 1, 1], [], []>} : vector<8x64xbf16>, vector<64x256xbf16>, vector<8x256xf32> -> vector<8x256xf32>
    %152 = arith.addf %149, %151 : vector<8x256xf32>
    %153 = vector.extract_strided_slice %152 {offsets = [0, 0], sizes = [8, 192], strides = [1, 1]} : vector<8x256xf32> to vector<8x192xf32>
    %154 = arith.negf %153 : vector<8x192xf32>
    %155 = math.exp %154 : vector<8x192xf32>
    %cst_31 = arith.constant 1.000000e+00 : f32
    %156 = vector.broadcast %cst_31 : f32 to vector<8x192xf32>
    %157 = arith.addf %156, %155 : vector<8x192xf32>
    %158 = arith.divf %156, %157 : vector<8x192xf32>
    %159 = vector.extract_strided_slice %158 {offsets = [0, 0], sizes = [8, 64], strides = [1, 1]} : vector<8x192xf32> to vector<8x64xf32>
    %160 = vector.extract_strided_slice %158 {offsets = [0, 64], sizes = [8, 64], strides = [1, 1]} : vector<8x192xf32> to vector<8x64xf32>
    %161 = vector.extract_strided_slice %158 {offsets = [0, 128], sizes = [8, 64], strides = [1, 1]} : vector<8x192xf32> to vector<8x64xf32>
    %162 = vector.extract_strided_slice %152 {offsets = [0, 192], sizes = [8, 64], strides = [1, 1]} : vector<8x256xf32> to vector<8x64xf32>
    %163 = math.tanh %162 : vector<8x64xf32>
    %164 = arith.mulf %160, %148 : vector<8x64xf32>
    %165 = arith.mulf %159, %163 : vector<8x64xf32>
    %166 = arith.addf %164, %165 : vector<8x64xf32>
    %167 = math.tanh %166 : vector<8x64xf32>
    %168 = arith.mulf %161, %167 : vector<8x64xf32>
    %c5_i32_32 = arith.constant 5 : i32
    %c4_i32_33 = arith.constant 4 : i32
    %169 = vector.broadcast %c5_i32_32 : i32 to vector<8x64xi32>
    %170 = vector.broadcast %c4_i32_33 : i32 to vector<8x64xi32>
    %171 = arith.select %11, %169, %170 : vector<8x64xi1>, vector<8x64xi32>
    %172 = vector.broadcast %0 : vector<8x1xi32> to vector<8x64xi32>
    %173 = arith.cmpi slt, %171, %172 : vector<8x64xi32>
    %174 = arith.select %173, %168, %147 : vector<8x64xi1>, vector<8x64xf32>
    %175 = arith.select %173, %166, %148 : vector<8x64xi1>, vector<8x64xf32>
    %c48 = arith.constant 48 : index
    %c0_34 = arith.constant 0 : index
    %176 = vector.load %arg10[%c48, %c0_34] : memref<80x256xf32, #tpu.memory_space<vmem>>, vector<8x256xf32>
    %177 = arith.truncf %174 : vector<8x64xf32> to vector<8x64xbf16>
    %cst_35 = arith.constant dense<0.000000e+00> : vector<8x256xf32>
    %178 = tpu.matmul %177, %8, %cst_35 {dimension_numbers = #tpu.dot_dimension_numbers<[1], [0], [0], [1], [0, 0, 1, 1], [], []>} : vector<8x64xbf16>, vector<64x256xbf16>, vector<8x256xf32> -> vector<8x256xf32>
    %179 = arith.addf %176, %178 : vector<8x256xf32>
    %180 = vector.extract_strided_slice %179 {offsets = [0, 0], sizes = [8, 192], strides = [1, 1]} : vector<8x256xf32> to vector<8x192xf32>
    %181 = arith.negf %180 : vector<8x192xf32>
    %182 = math.exp %181 : vector<8x192xf32>
    %cst_36 = arith.constant 1.000000e+00 : f32
    %183 = vector.broadcast %cst_36 : f32 to vector<8x192xf32>
    %184 = arith.addf %183, %182 : vector<8x192xf32>
    %185 = arith.divf %183, %184 : vector<8x192xf32>
    %186 = vector.extract_strided_slice %185 {offsets = [0, 0], sizes = [8, 64], strides = [1, 1]} : vector<8x192xf32> to vector<8x64xf32>
    %187 = vector.extract_strided_slice %185 {offsets = [0, 64], sizes = [8, 64], strides = [1, 1]} : vector<8x192xf32> to vector<8x64xf32>
    %188 = vector.extract_strided_slice %185 {offsets = [0, 128], sizes = [8, 64], strides = [1, 1]} : vector<8x192xf32> to vector<8x64xf32>
    %189 = vector.extract_strided_slice %179 {offsets = [0, 192], sizes = [8, 64], strides = [1, 1]} : vector<8x256xf32> to vector<8x64xf32>
    %190 = math.tanh %189 : vector<8x64xf32>
    %191 = arith.mulf %187, %175 : vector<8x64xf32>
    %192 = arith.mulf %186, %190 : vector<8x64xf32>
    %193 = arith.addf %191, %192 : vector<8x64xf32>
    %194 = math.tanh %193 : vector<8x64xf32>
    %195 = arith.mulf %188, %194 : vector<8x64xf32>
    %c6_i32_37 = arith.constant 6 : i32
    %c3_i32_38 = arith.constant 3 : i32
    %196 = vector.broadcast %c6_i32_37 : i32 to vector<8x64xi32>
    %197 = vector.broadcast %c3_i32_38 : i32 to vector<8x64xi32>
    %198 = arith.select %11, %196, %197 : vector<8x64xi1>, vector<8x64xi32>
    %199 = vector.broadcast %0 : vector<8x1xi32> to vector<8x64xi32>
    %200 = arith.cmpi slt, %198, %199 : vector<8x64xi32>
    %201 = arith.select %200, %195, %174 : vector<8x64xi1>, vector<8x64xf32>
    %202 = arith.select %200, %193, %175 : vector<8x64xi1>, vector<8x64xf32>
    %c56 = arith.constant 56 : index
    %c0_39 = arith.constant 0 : index
    %203 = vector.load %arg10[%c56, %c0_39] : memref<80x256xf32, #tpu.memory_space<vmem>>, vector<8x256xf32>
    %204 = arith.truncf %201 : vector<8x64xf32> to vector<8x64xbf16>
    %cst_40 = arith.constant dense<0.000000e+00> : vector<8x256xf32>
    %205 = tpu.matmul %204, %8, %cst_40 {dimension_numbers = #tpu.dot_dimension_numbers<[1], [0], [0], [1], [0, 0, 1, 1], [], []>} : vector<8x64xbf16>, vector<64x256xbf16>, vector<8x256xf32> -> vector<8x256xf32>
    %206 = arith.addf %203, %205 : vector<8x256xf32>
    %207 = vector.extract_strided_slice %206 {offsets = [0, 0], sizes = [8, 192], strides = [1, 1]} : vector<8x256xf32> to vector<8x192xf32>
    %208 = arith.negf %207 : vector<8x192xf32>
    %209 = math.exp %208 : vector<8x192xf32>
    %cst_41 = arith.constant 1.000000e+00 : f32
    %210 = vector.broadcast %cst_41 : f32 to vector<8x192xf32>
    %211 = arith.addf %210, %209 : vector<8x192xf32>
    %212 = arith.divf %210, %211 : vector<8x192xf32>
    %213 = vector.extract_strided_slice %212 {offsets = [0, 0], sizes = [8, 64], strides = [1, 1]} : vector<8x192xf32> to vector<8x64xf32>
    %214 = vector.extract_strided_slice %212 {offsets = [0, 64], sizes = [8, 64], strides = [1, 1]} : vector<8x192xf32> to vector<8x64xf32>
    %215 = vector.extract_strided_slice %212 {offsets = [0, 128], sizes = [8, 64], strides = [1, 1]} : vector<8x192xf32> to vector<8x64xf32>
    %216 = vector.extract_strided_slice %206 {offsets = [0, 192], sizes = [8, 64], strides = [1, 1]} : vector<8x256xf32> to vector<8x64xf32>
    %217 = math.tanh %216 : vector<8x64xf32>
    %218 = arith.mulf %214, %202 : vector<8x64xf32>
    %219 = arith.mulf %213, %217 : vector<8x64xf32>
    %220 = arith.addf %218, %219 : vector<8x64xf32>
    %221 = math.tanh %220 : vector<8x64xf32>
    %222 = arith.mulf %215, %221 : vector<8x64xf32>
    %c7_i32_42 = arith.constant 7 : i32
    %c2_i32_43 = arith.constant 2 : i32
    %223 = vector.broadcast %c7_i32_42 : i32 to vector<8x64xi32>
    %224 = vector.broadcast %c2_i32_43 : i32 to vector<8x64xi32>
    %225 = arith.select %11, %223, %224 : vector<8x64xi1>, vector<8x64xi32>
    %226 = vector.broadcast %0 : vector<8x1xi32> to vector<8x64xi32>
    %227 = arith.cmpi slt, %225, %226 : vector<8x64xi32>
    %228 = arith.select %227, %222, %201 : vector<8x64xi1>, vector<8x64xf32>
    %229 = arith.select %227, %220, %202 : vector<8x64xi1>, vector<8x64xf32>
    %c64 = arith.constant 64 : index
    %c0_44 = arith.constant 0 : index
    %230 = vector.load %arg10[%c64, %c0_44] : memref<80x256xf32, #tpu.memory_space<vmem>>, vector<8x256xf32>
    %231 = arith.truncf %228 : vector<8x64xf32> to vector<8x64xbf16>
    %cst_45 = arith.constant dense<0.000000e+00> : vector<8x256xf32>
    %232 = tpu.matmul %231, %8, %cst_45 {dimension_numbers = #tpu.dot_dimension_numbers<[1], [0], [0], [1], [0, 0, 1, 1], [], []>} : vector<8x64xbf16>, vector<64x256xbf16>, vector<8x256xf32> -> vector<8x256xf32>
    %233 = arith.addf %230, %232 : vector<8x256xf32>
    %234 = vector.extract_strided_slice %233 {offsets = [0, 0], sizes = [8, 192], strides = [1, 1]} : vector<8x256xf32> to vector<8x192xf32>
    %235 = arith.negf %234 : vector<8x192xf32>
    %236 = math.exp %235 : vector<8x192xf32>
    %cst_46 = arith.constant 1.000000e+00 : f32
    %237 = vector.broadcast %cst_46 : f32 to vector<8x192xf32>
    %238 = arith.addf %237, %236 : vector<8x192xf32>
    %239 = arith.divf %237, %238 : vector<8x192xf32>
    %240 = vector.extract_strided_slice %239 {offsets = [0, 0], sizes = [8, 64], strides = [1, 1]} : vector<8x192xf32> to vector<8x64xf32>
    %241 = vector.extract_strided_slice %239 {offsets = [0, 64], sizes = [8, 64], strides = [1, 1]} : vector<8x192xf32> to vector<8x64xf32>
    %242 = vector.extract_strided_slice %239 {offsets = [0, 128], sizes = [8, 64], strides = [1, 1]} : vector<8x192xf32> to vector<8x64xf32>
    %243 = vector.extract_strided_slice %233 {offsets = [0, 192], sizes = [8, 64], strides = [1, 1]} : vector<8x256xf32> to vector<8x64xf32>
    %244 = math.tanh %243 : vector<8x64xf32>
    %245 = arith.mulf %241, %229 : vector<8x64xf32>
    %246 = arith.mulf %240, %244 : vector<8x64xf32>
    %247 = arith.addf %245, %246 : vector<8x64xf32>
    %248 = math.tanh %247 : vector<8x64xf32>
    %249 = arith.mulf %242, %248 : vector<8x64xf32>
    %c8_i32_47 = arith.constant 8 : i32
    %c1_i32_48 = arith.constant 1 : i32
    %250 = vector.broadcast %c8_i32_47 : i32 to vector<8x64xi32>
    %251 = vector.broadcast %c1_i32_48 : i32 to vector<8x64xi32>
    %252 = arith.select %11, %250, %251 : vector<8x64xi1>, vector<8x64xi32>
    %253 = vector.broadcast %0 : vector<8x1xi32> to vector<8x64xi32>
    %254 = arith.cmpi slt, %252, %253 : vector<8x64xi32>
    %255 = arith.select %254, %249, %228 : vector<8x64xi1>, vector<8x64xf32>
    %256 = arith.select %254, %247, %229 : vector<8x64xi1>, vector<8x64xf32>
    %c72 = arith.constant 72 : index
    %c0_49 = arith.constant 0 : index
    %257 = vector.load %arg10[%c72, %c0_49] : memref<80x256xf32, #tpu.memory_space<vmem>>, vector<8x256xf32>
    %258 = arith.truncf %255 : vector<8x64xf32> to vector<8x64xbf16>
    %cst_50 = arith.constant dense<0.000000e+00> : vector<8x256xf32>
    %259 = tpu.matmul %258, %8, %cst_50 {dimension_numbers = #tpu.dot_dimension_numbers<[1], [0], [0], [1], [0, 0, 1, 1], [], []>} : vector<8x64xbf16>, vector<64x256xbf16>, vector<8x256xf32> -> vector<8x256xf32>
    %260 = arith.addf %257, %259 : vector<8x256xf32>
    %261 = vector.extract_strided_slice %260 {offsets = [0, 0], sizes = [8, 192], strides = [1, 1]} : vector<8x256xf32> to vector<8x192xf32>
    %262 = arith.negf %261 : vector<8x192xf32>
    %263 = math.exp %262 : vector<8x192xf32>
    %cst_51 = arith.constant 1.000000e+00 : f32
    %264 = vector.broadcast %cst_51 : f32 to vector<8x192xf32>
    %265 = arith.addf %264, %263 : vector<8x192xf32>
    %266 = arith.divf %264, %265 : vector<8x192xf32>
    %267 = vector.extract_strided_slice %266 {offsets = [0, 0], sizes = [8, 64], strides = [1, 1]} : vector<8x192xf32> to vector<8x64xf32>
    %268 = vector.extract_strided_slice %266 {offsets = [0, 64], sizes = [8, 64], strides = [1, 1]} : vector<8x192xf32> to vector<8x64xf32>
    %269 = vector.extract_strided_slice %266 {offsets = [0, 128], sizes = [8, 64], strides = [1, 1]} : vector<8x192xf32> to vector<8x64xf32>
    %270 = vector.extract_strided_slice %260 {offsets = [0, 192], sizes = [8, 64], strides = [1, 1]} : vector<8x256xf32> to vector<8x64xf32>
    %271 = math.tanh %270 : vector<8x64xf32>
    %272 = arith.mulf %268, %256 : vector<8x64xf32>
    %273 = arith.mulf %267, %271 : vector<8x64xf32>
    %274 = arith.addf %272, %273 : vector<8x64xf32>
    %275 = math.tanh %274 : vector<8x64xf32>
    %276 = arith.mulf %269, %275 : vector<8x64xf32>
    %c9_i32_52 = arith.constant 9 : i32
    %c0_i32_53 = arith.constant 0 : i32
    %277 = vector.broadcast %c9_i32_52 : i32 to vector<8x64xi32>
    %278 = vector.broadcast %c0_i32_53 : i32 to vector<8x64xi32>
    %279 = arith.select %11, %277, %278 : vector<8x64xi1>, vector<8x64xi32>
    %280 = vector.broadcast %0 : vector<8x1xi32> to vector<8x64xi32>
    %281 = arith.cmpi slt, %279, %280 : vector<8x64xi32>
    %282 = arith.select %281, %276, %255 : vector<8x64xi1>, vector<8x64xf32>
    %c0_54 = arith.constant 0 : index
    %c0_55 = arith.constant 0 : index
    %283 = vector.load %arg7[%c0_54, %c0_55] : memref<64x2xf32, #tpu.memory_space<vmem>>, vector<64x2xf32>
    %cst_56 = arith.constant dense<0.000000e+00> : vector<8x2xf32>
    %284 = tpu.matmul %282, %283, %cst_56 {dimension_numbers = #tpu.dot_dimension_numbers<[1], [0], [0], [1], [0, 0, 1, 1], [], []>} : vector<8x64xf32>, vector<64x2xf32>, vector<8x2xf32> -> vector<8x2xf32>
    %c0_57 = arith.constant 0 : index
    %c0_58 = arith.constant 0 : index
    %285 = vector.load %arg8[%c0_57, %c0_58] : memref<1x2xf32, #tpu.memory_space<vmem>>, vector<1x2xf32>
    %286 = vector.broadcast %285 : vector<1x2xf32> to vector<8x2xf32>
    %287 = arith.addf %284, %286 : vector<8x2xf32>
    %c0_59 = arith.constant 0 : index
    %c0_60 = arith.constant 0 : index
    %288 = vector.load %arg2[%c0_59, %c0_60] : memref<8x1xi32, #tpu.memory_space<vmem>>, vector<8x1xi32>
    %289 = tpu.iota {dimensions = array<i32: 1>} : vector<8x2xi32>
    %290 = vector.broadcast %288 : vector<8x1xi32> to vector<8x2xi32>
    %291 = arith.cmpi eq, %289, %290 : vector<8x2xi32>
    %292 = arith.extui %291 : vector<8x2xi1> to vector<8x2xi32>
    %293 = arith.sitofp %292 : vector<8x2xi32> to vector<8x2xf32>
    %cst_61 = arith.constant dense<0xFF800000> : vector<8xf32>
    %294 = vector.multi_reduction <maximumf>, %287, %cst_61 [1] : vector<8x2xf32> to vector<8xf32>
    %295 = vector.shape_cast %294 : vector<8xf32> to vector<8x1xf32>
    %296 = vector.broadcast %295 : vector<8x1xf32> to vector<8x2xf32>
    %297 = arith.subf %287, %296 : vector<8x2xf32>
    %298 = math.exp %297 : vector<8x2xf32>
    %cst_62 = arith.constant dense<0.000000e+00> : vector<8xf32>
    %299 = vector.multi_reduction <add>, %298, %cst_62 [1] : vector<8x2xf32> to vector<8xf32>
    %300 = vector.shape_cast %299 : vector<8xf32> to vector<8x1xf32>
    %301 = math.log %300 : vector<8x1xf32>
    %302 = arith.addf %295, %301 : vector<8x1xf32>
    %303 = arith.mulf %287, %293 : vector<8x2xf32>
    %cst_63 = arith.constant dense<0.000000e+00> : vector<8xf32>
    %304 = vector.multi_reduction <add>, %303, %cst_63 [1] : vector<8x2xf32> to vector<8xf32>
    %305 = vector.shape_cast %304 : vector<8xf32> to vector<8x1xf32>
    %306 = arith.subf %302, %305 : vector<8x1xf32>
    %307 = vector.shape_cast %306 : vector<8x1xf32> to vector<1x8x1xf32>
    %cst_64 = arith.constant dense<0.000000e+00> : vector<1xf32>
    %308 = vector.multi_reduction <add>, %307, %cst_64 [1, 2] : vector<1x8x1xf32> to vector<1xf32>
    %309 = vector.shape_cast %308 : vector<1xf32> to vector<1x1x1xf32>
    %310 = vector.extract %309[0, 0, 0] : f32 from vector<1x1x1xf32>
    %cst_65 = arith.constant 1.250000e-01 : f32
    %311 = arith.mulf %310, %cst_65 : f32
    %312 = vector.broadcast %311 : f32 to vector<1x1xf32>
    %c0_66 = arith.constant 0 : index
    %c0_67 = arith.constant 0 : index
    %313 = vector.load %arg9[%c0_66, %c0_67] : memref<1x1xf32, #tpu.memory_space<vmem>>, vector<1x1xf32>
    tpu.vector_store %arg9[%c0_66, %c0_67], %312 {strides = array<i32>} : memref<1x1xf32, #tpu.memory_space<vmem>>, vector<1x1xf32>,
    return
  }
  func.func @transform_0(%arg0: i32) -> (i32, i32) {
    %c0_i32 = arith.constant 0 : i32
    %c0_i32_0 = arith.constant 0 : i32
    %c0_i32_1 = arith.constant 0 : i32
    return %c0_i32, %c0_i32_0 : i32, i32
  }
  func.func @transform_1(%arg0: i32) -> (i32, i32) {
    %c0_i32 = arith.constant 0 : i32
    %c0_i32_0 = arith.constant 0 : i32
    %c0_i32_1 = arith.constant 0 : i32
    return %c0_i32, %c0_i32_0 : i32, i32
  }
  func.func @transform_2(%arg0: i32) -> (i32, i32) {
    %c0_i32 = arith.constant 0 : i32
    %c0_i32_0 = arith.constant 0 : i32
    %c0_i32_1 = arith.constant 0 : i32
    return %c0_i32, %c0_i32_0 : i32, i32
  }
  func.func @transform_3(%arg0: i32) -> (i32, i32) {
    %c0_i32 = arith.constant 0 : i32
    %c0_i32_0 = arith.constant 0 : i32
    %c0_i32_1 = arith.constant 0 : i32
    return %c0_i32, %c0_i32_0 : i32, i32
  }
  func.func @transform_4(%arg0: i32) -> (i32, i32) {
    %c0_i32 = arith.constant 0 : i32
    %c0_i32_0 = arith.constant 0 : i32
    %c0_i32_1 = arith.constant 0 : i32
    return %c0_i32, %c0_i32_0 : i32, i32
  }
  func.func @transform_5(%arg0: i32) -> (i32, i32) {
    %c0_i32 = arith.constant 0 : i32
    %c0_i32_0 = arith.constant 0 : i32
    %c0_i32_1 = arith.constant 0 : i32
    return %c0_i32, %c0_i32_0 : i32, i32
  }
  func.func @transform_6(%arg0: i32) -> (i32, i32) {
    %c0_i32 = arith.constant 0 : i32
    %c0_i32_0 = arith.constant 0 : i32
    %c0_i32_1 = arith.constant 0 : i32
    return %c0_i32, %c0_i32_0 : i32, i32
  }
  func.func @transform_7(%arg0: i32) -> (i32, i32) {
    %c0_i32 = arith.constant 0 : i32
    %c0_i32_0 = arith.constant 0 : i32
    %c0_i32_1 = arith.constant 0 : i32
    return %c0_i32, %c0_i32_0 : i32, i32
  }
  func.func @transform_8(%arg0: i32) -> (i32, i32) {
    %c0_i32 = arith.constant 0 : i32
    %c0_i32_0 = arith.constant 0 : i32
    %c0_i32_1 = arith.constant 0 : i32
    return %c0_i32, %c0_i32_0 : i32, i32
  }
}

</mosaic_0001>

<bundles_post_ra>
// kernel: tpu_custom_call.1
= control target key start
LH: loop header
LB: loop body
LE: loop exit
PB: predicated region body
PF: predicated region fallthrough
CT: control target
= control target key end

     0   :  { %v1661_v18 = vmov 0   ;;  %vm97_vm0 = vcmask 261120   ;;  %s2189_s0 = inlined_call_operand.vmem [shape: s32[8,1], index: 0, kind: input, shape index: {}]   ;;  %s2190_s1 = inlined_call_operand.vmem [shape: s32[8,1], index: 1, kind: input, shape index: {}]   ;;  %s2191_s2 = inlined_call_operand.vmem [shape: bf16[80,32], index: 2, kind: input, shape index: {}]   ;;  %s2192_s3 = inlined_call_operand.vmem [shape: bf16[32,256], index: 3, kind: input, shape index: {}]   ;;  %s2193_s4 = inlined_call_operand.vmem [shape: bf16[64,256], index: 4, kind: input, shape index: {}]   ;;  %s2194_s5 = inlined_call_operand.vmem [shape: f32[1,256], index: 5, kind: input, shape index: {}]   ;;  %s2195_s6 = inlined_call_operand.vmem [shape: f32[64,2], index: 6, kind: input, shape index: {}]   ;;  %s2196_s7 = inlined_call_operand.vmem [shape: f32[1,2], index: 7, kind: input, shape index: {}]   ;;  %s2197_s8 = inlined_call_operand.hbm [shape: f32[1,1], index: 8, kind: output, shape index: {}]  }
   0x1   :  { %v1490_v0 = vld [vmem:[%s2193_s4 + $0x34] sm:$0xf]  ;;  %v1431_v1 = vld [vmem:[%s2193_s4 + $0x38] sm:$0xf0]  ;;  %v1488_v5 = vld [vmem:[%s2193_s4 + $0x24] sm:$0xf]  ;;  %1507 = vset.pattern.permute.xlu1 %v1661_v18  ;;  %1508 = vset.pattern.permute.xlu2 %v1661_v18 }
   0x2   :  { %v1482_v2 = vld [vmem:[%s2192_s3 + $0x14] sm:$0xf]  ;;  %v1728_v3 = vor.u32 %v1490_v0, %v1431_v1  ;;  %v1389_v4 = vld [vmem:[%s2192_s3 + $0x18] sm:$0xf0]  ;;  %v1423_v6 = vld [vmem:[%s2193_s4 + $0x28] sm:$0xf0]  ;;  %1509 = vset.pattern.permute.xlu0 %v1661_v18 }
   0x3   :  { %v1392_v7 = vor.u32 %v1482_v2, %v1389_v4  ;;  %v1480_v8 = vld [vmem:[%s2192_s3 + $0x4] sm:$0xf]  ;;  %v1381_v9 = vld [vmem:[%s2192_s3 + $0x8] sm:$0xf0]  ;;  %v1746_v10 = vor.u32 %v1488_v5, %v1423_v6  ;;  %v1486_v11 = vld [vmem:[%s2193_s4 + $0x14] sm:$0xf] }
   0x4   :  { %275 = vmatpush.bf16.msra.mxu3 %v1728_v3  ;;  %v1384_v12 = vor.u32 %v1480_v8, %v1381_v9  ;;  %v1415_v13 = vld [vmem:[%s2193_s4 + $0x18] sm:$0xf0]  ;;  %v1429_v14 = vld [vmem:[%s2193_s4 + $0x30] sm:$0xf]  ;;  %v1491_v15 = vld [vmem:[%s2193_s4 + $0x34] sm:$0xf0] }
   0x5   :  { %153 = vmatpush.bf16.msra.mxu1 %v1392_v7  ;;  %v1421_v16 = vld [vmem:[%s2193_s4 + $0x20] sm:$0xf]  ;;  %v1489_v17 = vld [vmem:[%s2193_s4 + $0x24] sm:$0xf0]  ;;  %v1771_v20 = vor.u32 %v1491_v15, %v1429_v14  ;;  %v1387_v21 = vld [vmem:[%s2192_s3 + $0x10] sm:$0xf]  ;;  %v1778_v22 = vor.u32 %v1486_v11, %v1415_v13 }
   0x6   :  { %v1475_v19 = vld [vmem:[%s2191_s2] sm:$0xff]  ;;  %v1407_v24 = vld [vmem:[%s2193_s4 + $0x8] sm:$0xf0]  ;;  %v1483_v25 = vld [vmem:[%s2192_s3 + $0x14] sm:$0xf0]  ;;  %v1790_v26 = vor.u32 %v1489_v17, %v1421_v16 }
   0x7   :  { %v1484_v23 = vld [vmem:[%s2193_s4 + $0x4] sm:$0xf]  ;;  %262 = vmatpush.bf16.msra.mxu2 %v1771_v20  ;;  %v1413_v27 = vld [vmem:[%s2193_s4 + $0x10] sm:$0xf]  ;;  %v1388_v28 = vor.u32 %v1483_v25, %v1387_v21  ;;  %v1379_v29 = vld [vmem:[%s2192_s3] sm:$0xf] }
   0x8   :  { %276 = vmatpush.bf16.msra.mxu3 %v1746_v10  ;;  %v1481_v30 = vld [vmem:[%s2192_s3 + $0x4] sm:$0xf0]  ;;  %v1487_v31 = vld [vmem:[%s2193_s4 + $0x14] sm:$0xf0] }
   0x9   :  { %154 = vmatpush.bf16.msra.mxu1 %v1384_v12 }
   0xd   :  { %784 = vmatpush.bf16.msrb.mxu1 %v1728_v3 }
   0xe   :  { %13 = vsyncpa [#allocation4], 0  ;;  %119 = vmatpush.bf16.msra.mxu0 %v1388_v28  ;;  %v1380_v32 = vor.u32 %v1481_v30, %v1379_v29  ;;  %277 = vmatpush.bf16.msra.mxu3 %v1778_v22  ;;  %v1807_v33 = vor.u32 %v1484_v23, %v1407_v24  ;;  %v1810_v34 = vor.u32 %v1487_v31, %v1413_v27  ;;  %v1405_v35 = vld [vmem:[%s2193_s4] sm:$0xf]  ;;  %v1485_v36 = vld [vmem:[%s2193_s4 + $0x4] sm:$0xf0]  ;;  %v209_v16 = vlaneseq }
   0xf   :  { %1398 = vmatmul.msk.bf16.vlgmr.msra.gmra.mxu1 %vm97_vm0, %v1475_v19  ;;  %263 = vmatpush.bf16.msra.mxu2 %v1790_v26  ;;  %v1822_v37 = vor.u32 %v1485_v36, %v1405_v35  ;;  %v46_v38 = vld [vmem:[%s2194_s5] sm:$0x3]  ;;  %s1662_s11 = smov 64   ;;  %v1663_v29 = vmov 9   ;;  %vm254_vm11 = vcmask 523264   ;;  %s1348_s14 = sshll.u32 %s2197_s8, 4  ;;  %s1349_s14 = int_to_ptr.hbm [resolvable:$true] %s1348_s14 }
  0x10   :  { %v1860_v39 = vperm.slane %v46_v38, 1  ;;  %v1864_v48 = vperm.slane %v46_v38, 0  ;;  %v31_v8 = vld [vmem:[%s2189_s0] sm:$0xff] }
  0x11   :  { %785 = vmatpush.bf16.msrb.mxu1 %v1746_v10 }
  0x12   :  { %120 = vmatpush.bf16.msra.mxu0 %v1380_v32  ;;  %278 = vmatpush.bf16.msra.mxu3 %v1807_v33 }
  0x13   :  { %264 = vmatpush.bf16.msra.mxu2 %v1810_v34 }
  0x15   :  { %1393 = vmatmul.msk.bf16.vlgmr.msra.gmra.mxu0 %vm97_vm0, %v1475_v19  ;;  %786 = vmatpush.bf16.msrb.mxu1 %v1778_v22  ;;  %v1873_v19 = vand.u32 127, %v209_v16 }
  0x16   :  { %771 = vmatpush.bf16.msrb.mxu0 %v1771_v20  ;;  %376 = vmatpush.bf16.msrb.mxu3 %v1728_v3 }
  0x17   :  { %279 = vmatmul.bf16.vlgmr.msra.gmra.mxu3 %v1661_v18  ;;  %265 = vmatpush.bf16.msra.mxu2 %v1822_v37  ;;  %vm211_vm8 = vcmp.lt.s32.totalorder %v1873_v19, 32 }
  0x18   :  { %v342_v30 = vsel %vm211_vm8, 0, %v1663_v29 }
  0x19   :  { %787 = vmatpush.bf16.msrb.mxu1 %v1807_v33 }
  0x1a   :  { %772 = vmatpush.bf16.msrb.mxu0 %v1790_v26  ;;  %377 = vmatpush.bf16.msrb.mxu3 %v1746_v10 }
  0x1b   :  { %363 = vmatpush.bf16.msrb.mxu2 %v1771_v20 }
  0x1c   :  { %266 = vmatmul.bf16.vlgmr.msra.gmra.mxu2 %v1661_v18 }
  0x1d   :  { %988 = vmatpush.bf16.msra.mxu1 %v1728_v3 }
  0x1e   :  { %773 = vmatpush.bf16.msrb.mxu0 %v1810_v34  ;;  %378 = vmatpush.bf16.msrb.mxu3 %v1778_v22 }
  0x1f   :  { %364 = vmatpush.bf16.msrb.mxu2 %v1790_v26 }
  0x21   :  { %989 = vmatpush.bf16.msra.mxu1 %v1746_v10 }
  0x22   :  { %774 = vmatpush.bf16.msrb.mxu0 %v1822_v37  ;;  %379 = vmatpush.bf16.msrb.mxu3 %v1807_v33 }
  0x23   :  { %365 = vmatpush.bf16.msrb.mxu2 %v1810_v34 }
  0x25   :  { %990 = vmatpush.bf16.msra.mxu1 %v1778_v22 }
  0x26   :  { %975 = vmatpush.bf16.msra.mxu0 %v1771_v20  ;;  %478 = vmatpush.bf16.msra.mxu3 %v1728_v3 }
  0x27   :  { %366 = vmatpush.bf16.msrb.mxu2 %v1822_v37 }
  0x29   :  { %991 = vmatpush.bf16.msra.mxu1 %v1807_v33 }
  0x2a   :  { %976 = vmatpush.bf16.msra.mxu0 %v1790_v26  ;;  %479 = vmatpush.bf16.msra.mxu3 %v1746_v10 }
  0x2b   :  { %465 = vmatpush.bf16.msra.mxu2 %v1771_v20 }
  0x2e   :  { %977 = vmatpush.bf16.msra.mxu0 %v1810_v34  ;;  %480 = vmatpush.bf16.msra.mxu3 %v1778_v22 }
  0x2f   :  { %466 = vmatpush.bf16.msra.mxu2 %v1790_v26 }
  0x32   :  { %978 = vmatpush.bf16.msra.mxu0 %v1822_v37  ;;  %481 = vmatpush.bf16.msra.mxu3 %v1807_v33 }
  0x33   :  { %467 = vmatpush.bf16.msra.mxu2 %v1810_v34 }
  0x37   :  { %468 = vmatpush.bf16.msra.mxu2 %v1822_v37 }
  0x8c   :  { %v156_v40 = vpop.f32.mrf.mxu1 }
  0x8d   :  { %v157_v41 = vadd.f32 %v156_v40, %v1860_v39 }
  0x92   :  { %v122_v49 = vpop.f32.mrf.mxu0 }
  0x93   :  { %v123_v50 = vadd.f32 %v122_v49, %v1864_v48 }
  0x9a   :  { %v280_v42 = vpop.f32.mrf.mxu3 }
  0x9b   :  { %v285_v43 = vadd.f32 %v280_v42, %v157_v41  ;;  %v158_v42 = vpop.f32.mrf.mxu1 }
  0x9d   :  { %1511 = vtanh.f32 %v285_v43  ;;  %v1436_v9 = vmul.f32 -1.442695, %v285_v43  ;;  %v159_v43 = vadd.f32 %v158_v42, %v1860_v39 }
  0x9f   :  { %v267_v44 = vpop.f32.mrf.mxu2 }
  0xa0   :  { %v284_v51 = vadd.f32 %v267_v44, %v123_v50 }
  0xa2   :  { %v282_v45 = vpop.f32.mrf.mxu3  ;;  %v1435_v52 = vmul.f32 -1.442695, %v284_v51  ;;  %v124_v51 = vpop.f32.mrf.mxu0 }
  0xa3   :  { %v1512_v46 = vpop.eup %1511 }
  0xa4   :  { %327 = vrot.lane.b32.xlu0 %v1512_v46, %s1662_s11  ;;  %1513 = vpow2.f32 %v1435_v52  ;;  %v125_v52 = vadd.f32 %v124_v51, %v1864_v48 }
  0xa7   :  { %v269_v47 = vpop.f32.mrf.mxu2 }
  0xaa   :  { %v1514_v53 = vpop.eup %1513 }
  0xab   :  { %v292_v54 = vadd.f32 1.0, %v1514_v53 }
  0xad   :  { %1515 = vrcp.f32 %v292_v54  ;;  %vm299_vm1 = vweird.f32 %v292_v54  ;;  %v305_v59 = vand.u32 2147483648, %v292_v54  ;;  %v303_v61 = vand.u32 2147483647, %v292_v54 }
  0xaf   :  { %v306_v62 = vor.u32 1.1754944e-38, %v305_v59  ;;  %vm304_vm4 = vcmp.eq.f32.partialorder %v303_v61, 8.507059e+37 }
  0xb3   :  { %v1516_v55 = vpop.eup %1515 }
  0xb4   :  { %v295_v56 = vmul.f32 %v1516_v55, %v292_v54  ;;  %vm300_vm2 = vweird.f32 %v1516_v55 }
  0xb5   :  { %vm301_vm3 = vmor %vm299_vm1, %vm300_vm2 }
  0xb6   :  { %v296_v57 = vsub.f32 1.0, %v295_v56 }
  0xb8   :  { %v297_v58 = vmul.f32 %v1516_v55, %v296_v57 }
  0xba   :  { %v298_v60 = vadd.f32 %v1516_v55, %v297_v58 }
  0xbc   :  { %v302_v63 = vsel %vm301_vm3, %v1516_v55, %v298_v60 }
  0xbd   :  { %v307_v1 = vsel %vm304_vm4, %v306_v62, %v302_v63 }
  0xbe   :  { %v325_v4 = vmul.f32 0.0, %v307_v1 }
 0x116   :  { %v328_v0 = vpop.permute.xlu0 %327 }
 0x117   :  { %v330_v2 = vmul.f32 %v328_v0, %v307_v1 }
 0x119   :  { %332 = vrot.lane.b32.xlu0 %v330_v2, %s1662_s11 }
 0x18b   :  { %v333_v5 = vpop.permute.xlu0 %332 }
 0x18c   :  { %v335_v6 = vadd.f32 %v333_v5, %v325_v4 }
 0x18e   :  { %1517 = vtanh.f32 %v335_v6  ;;  %349 = vrot.lane.b32.xlu2 %v335_v6, %s1662_s11 }
 0x18f   :  { %1519 = vpow2.f32 %v1436_v9 }
 0x194   :  { %v1518_v7 = vpop.eup %1517 }
 0x195   :  { %338 = vrot.lane.b32.xlu1 %v1518_v7, %s1662_s11  ;;  %v1520_v11 = vpop.eup %1519 }
 0x196   :  { %v293_v12 = vadd.f32 1.0, %v1520_v11 }
 0x198   :  { %1521 = vrcp.f32 %v293_v12  ;;  %v320_v24 = vand.u32 2147483648, %v293_v12  ;;  %vm314_vm6 = vweird.f32 %v293_v12  ;;  %v318_v25 = vand.u32 2147483647, %v293_v12 }
 0x19a   :  { %v321_v28 = vor.u32 1.1754944e-38, %v320_v24  ;;  %vm319_vm9 = vcmp.eq.f32.partialorder %v318_v25, 8.507059e+37 }
 0x19d   :  { %344 = vperm.xlu1 %1507, %v31_v8  }
 0x19e   :  { %v1522_v13 = vpop.eup %1521 }
 0x19f   :  { %v310_v14 = vmul.f32 %v1522_v13, %v293_v12  ;;  %vm315_vm5 = vweird.f32 %v1522_v13 }
 0x1a0   :  { %vm316_vm7 = vmor %vm314_vm6, %vm315_vm5 }
 0x1a1   :  { %v311_v15 = vsub.f32 1.0, %v310_v14 }
 0x1a3   :  { %v312_v17 = vmul.f32 %v1522_v13, %v311_v15  ;;  %v1476_v15 = vld [vmem:[%s2191_s2 + $0x8] sm:$0xff] }
 0x1a4   :  { %1399 = vmatmul.msk.bf16.gmra.mxu1 %vm97_vm0, %v1476_v15  ;;  %1394 = vmatmul.msk.bf16.gmra.mxu0 %vm97_vm0, %v1476_v15 }
 0x1a5   :  { %v313_v21 = vadd.f32 %v1522_v13, %v312_v17 }
 0x1a7   :  { %v317_v27 = vsel %vm316_vm7, %v1522_v13, %v313_v21 }
 0x1a8   :  { %v322_v31 = vsel %vm319_vm9, %v321_v28, %v317_v27 }
 0x1e8   :  { %v350_v36 = vpop.permute.xlu2 %349 }
 0x207   :  { %v339_v23 = vpop.permute.xlu1 %338 }
 0x208   :  { %v341_v32 = vmul.f32 %v339_v23, %v322_v31 }
 0x20f   :  { %v1878_v35 = vpop.permute.xlu1 %344 }
 0x210   :  { %vm346_vm10 = vcmp.lt.s32.totalorder %v342_v30, %v1878_v35  ;;  %v1664_v30 = vmov 8  }
 0x211   :  { %v1881_v38 = vsel %vm346_vm10, %v350_v36, 0.0  ;;  %v1883_v40 = vsel %vm346_vm10, %v341_v32, 0.0  ;;  %v447_v31 = vsel %vm211_vm8, 1, %v1664_v30 }
 0x212   :  { %427 = vrot.lane.b32.xlu0 %v1881_v38, %s1662_s11  ;;  %v355_v41 = vpack.c.bf16 %v1883_v40, %v1883_v40  ;;  %vm448_vm5 = vcmp.lt.s32.totalorder %v447_v31, %v1878_v35 }
 0x214   :  { %1437 = vmatmul.msk.bf16.vlgmr.msrb.gmra.mxu2 %vm254_vm11, %v355_v41  ;;  %1438 = vmatmul.msk.bf16.vlgmr.msrb.gmra.mxu3 %vm254_vm11, %v355_v41 }
 0x215   :  { %580 = vmatpush.bf16.msrb.mxu3 %v1728_v3  ;;  %567 = vmatpush.bf16.msrb.mxu2 %v1771_v20 }
 0x219   :  { %581 = vmatpush.bf16.msrb.mxu3 %v1746_v10  ;;  %568 = vmatpush.bf16.msrb.mxu2 %v1790_v26 }
 0x21d   :  { %582 = vmatpush.bf16.msrb.mxu3 %v1778_v22  ;;  %569 = vmatpush.bf16.msrb.mxu2 %v1810_v34 }
 0x221   :  { %583 = vmatpush.bf16.msrb.mxu3 %v1807_v33  ;;  %570 = vmatpush.bf16.msrb.mxu2 %v1822_v37 }
 0x284   :  { %v428_v6 = vpop.permute.xlu0 %427 }
 0x297   :  { %v368_v44 = vpop.f32.mrf.mxu2  ;;  %v381_v45 = vpop.f32.mrf.mxu3 }
 0x298   :  { %v386_v46 = vadd.f32 %v381_v45, %v159_v43  ;;  %v385_v53 = vadd.f32 %v368_v44, %v125_v52  ;;  %v161_v45 = vpop.f32.mrf.mxu1 }
 0x29a   :  { %1523 = vtanh.f32 %v386_v46  ;;  %v1439_v54 = vmul.f32 -1.442695, %v385_v53  ;;  %v1440_v12 = vmul.f32 -1.442695, %v386_v46  ;;  %v162_v46 = vadd.f32 %v161_v45, %v1860_v39 }
 0x29c   :  { %1525 = vpow2.f32 %v1439_v54  ;;  %v127_v54 = vpop.f32.mrf.mxu0 }
 0x29f   :  { %v370_v47 = vpop.f32.mrf.mxu2  ;;  %v383_v49 = vpop.f32.mrf.mxu3 }
 0x2a0   :  { %v1524_v50 = vpop.eup %1523 }
 0x2a1   :  { %432 = vrot.lane.b32.xlu2 %v1524_v50, %s1662_s11 }
 0x2a2   :  { %v1526_v55 = vpop.eup %1525 }
 0x2a3   :  { %v393_v56 = vadd.f32 1.0, %v1526_v55 }
 0x2a5   :  { %1527 = vrcp.f32 %v393_v56  ;;  %v406_v62 = vand.u32 2147483648, %v393_v56  ;;  %vm400_vm13 = vweird.f32 %v393_v56  ;;  %v404_v63 = vand.u32 2147483647, %v393_v56 }
 0x2a7   :  { %v407_v1 = vor.u32 1.1754944e-38, %v406_v62  ;;  %vm405_vm15 = vcmp.eq.f32.partialorder %v404_v63, 8.507059e+37 }
 0x2ab   :  { %v1528_v57 = vpop.eup %1527 }
 0x2ac   :  { %v396_v58 = vmul.f32 %v1528_v57, %v393_v56  ;;  %vm401_vm12 = vweird.f32 %v1528_v57 }
 0x2ad   :  { %vm402_vm14 = vmor %vm400_vm13, %vm401_vm12 }
 0x2ae   :  { %v397_v59 = vsub.f32 1.0, %v396_v58 }
 0x2b0   :  { %v398_v60 = vmul.f32 %v1528_v57, %v397_v59 }
 0x2b2   :  { %v399_v61 = vadd.f32 %v1528_v57, %v398_v60 }
 0x2b4   :  { %v403_v0 = vsel %vm402_vm14, %v1528_v57, %v399_v61 }
 0x2b5   :  { %v408_v4 = vsel %vm405_vm15, %v407_v1, %v403_v0 }
 0x2b6   :  { %v430_v7 = vmul.f32 %v428_v6, %v408_v4 }
 0x2fb   :  { %v433_v2 = vpop.permute.xlu2 %432 }
 0x2fc   :  { %v435_v5 = vmul.f32 %v433_v2, %v408_v4 }
 0x2fe   :  { %437 = vrot.lane.b32.xlu1 %v435_v5, %s1662_s11 }
 0x370   :  { %v438_v8 = vpop.permute.xlu1 %437 }
 0x371   :  { %v440_v9 = vadd.f32 %v438_v8, %v430_v7 }
 0x373   :  { %1529 = vtanh.f32 %v440_v9  ;;  %451 = vrot.lane.b32.xlu0 %v440_v9, %s1662_s11 }
 0x374   :  { %1531 = vpow2.f32 %v1440_v12 }
 0x379   :  { %v1530_v11 = vpop.eup %1529 }
 0x37a   :  { %443 = vrot.lane.b32.xlu2 %v1530_v11, %s1662_s11  ;;  %v1532_v13 = vpop.eup %1531 }
 0x37b   :  { %v394_v14 = vadd.f32 1.0, %v1532_v13 }
 0x37d   :  { %1533 = vrcp.f32 %v394_v14  ;;  %v421_v25 = vand.u32 2147483648, %v394_v14  ;;  %vm415_vm2 = vweird.f32 %v394_v14  ;;  %v419_v27 = vand.u32 2147483647, %v394_v14 }
 0x37f   :  { %v422_v29 = vor.u32 1.1754944e-38, %v421_v25  ;;  %vm420_vm4 = vcmp.eq.f32.partialorder %v419_v27, 8.507059e+37 }
 0x383   :  { %v1534_v16 = vpop.eup %1533 }
 0x384   :  { %v411_v17 = vmul.f32 %v1534_v16, %v394_v14  ;;  %vm416_vm1 = vweird.f32 %v1534_v16 }
 0x385   :  { %vm417_vm3 = vmor %vm415_vm2, %vm416_vm1 }
 0x386   :  { %v412_v21 = vsub.f32 1.0, %v411_v17 }
 0x388   :  { %v413_v23 = vmul.f32 %v1534_v16, %v412_v21 }
 0x38a   :  { %v414_v24 = vadd.f32 %v1534_v16, %v413_v23 }
 0x38c   :  { %v418_v28 = vsel %vm417_vm3, %v1534_v16, %v414_v24  ;;  %v1665_v16 = vmov 7  }
 0x38d   :  { %v423_v32 = vsel %vm420_vm4, %v422_v29, %v418_v28  ;;  %v549_v17 = vsel %vm211_vm8, 2, %v1665_v16 }
 0x38e   :  { %vm550_vm12 = vcmp.lt.s32.totalorder %v549_v17, %v1878_v35 }
 0x3d4   :  { %v444_v36 = vpop.permute.xlu2 %443 }
 0x3d5   :  { %v446_v41 = vmul.f32 %v444_v36, %v423_v32 }
 0x3d7   :  { %v1914_v42 = vsel %vm448_vm5, %v446_v41, %v1883_v40 }
 0x3d8   :  { %v457_v43 = vpack.c.bf16 %v1914_v42, %v1914_v42 }
 0x3da   :  { %1441 = vmatmul.msk.bf16.vlgmr.msra.gmra.mxu2 %vm254_vm11, %v457_v43  ;;  %1442 = vmatmul.msk.bf16.vlgmr.msra.gmra.mxu3 %vm254_vm11, %v457_v43 }
 0x3db   :  { %682 = vmatpush.bf16.msra.mxu3 %v1728_v3  ;;  %669 = vmatpush.bf16.msra.mxu2 %v1771_v20 }
 0x3df   :  { %683 = vmatpush.bf16.msra.mxu3 %v1746_v10  ;;  %670 = vmatpush.bf16.msra.mxu2 %v1790_v26 }
 0x3e3   :  { %684 = vmatpush.bf16.msra.mxu3 %v1778_v22  ;;  %671 = vmatpush.bf16.msra.mxu2 %v1810_v34 }
 0x3e5   :  { %v452_v40 = vpop.permute.xlu0 %451 }
 0x3e6   :  { %v454_v44 = vsel %vm448_vm5, %v452_v40, %v1881_v38  ;;  %v128_v38 = vadd.f32 %v127_v54, %v1864_v48 }
 0x3e7   :  { %529 = vrot.lane.b32.xlu2 %v454_v44, %s1662_s11  ;;  %685 = vmatpush.bf16.msra.mxu3 %v1807_v33 }
 0x3e8   :  { %672 = vmatpush.bf16.msra.mxu2 %v1822_v37 }
 0x441   :  { %v530_v8 = vpop.permute.xlu2 %529 }
 0x45d   :  { %v470_v47 = vpop.f32.mrf.mxu2  ;;  %v483_v49 = vpop.f32.mrf.mxu3 }
 0x45e   :  { %v488_v50 = vadd.f32 %v483_v49, %v162_v46  ;;  %v487_v55 = vadd.f32 %v470_v47, %v128_v38  ;;  %v129_v38 = vpop.f32.mrf.mxu0 }
 0x460   :  { %1535 = vtanh.f32 %v488_v50  ;;  %v1443_v56 = vmul.f32 -1.442695, %v487_v55  ;;  %v1444_v14 = vmul.f32 -1.442695, %v488_v50  ;;  %v130_v55 = vadd.f32 %v129_v38, %v1864_v48 }
 0x462   :  { %1537 = vpow2.f32 %v1443_v56 }
 0x465   :  { %v472_v51 = vpop.f32.mrf.mxu2  ;;  %v485_v52 = vpop.f32.mrf.mxu3 }
 0x466   :  { %v1536_v53 = vpop.eup %1535 }
 0x467   :  { %534 = vrot.lane.b32.xlu1 %v1536_v53, %s1662_s11 }
 0x468   :  { %v1538_v57 = vpop.eup %1537 }
 0x469   :  { %v495_v58 = vadd.f32 1.0, %v1538_v57 }
 0x46b   :  { %1539 = vrcp.f32 %v495_v58  ;;  %v508_v0 = vand.u32 2147483648, %v495_v58  ;;  %vm502_vm7 = vweird.f32 %v495_v58  ;;  %v506_v1 = vand.u32 2147483647, %v495_v58 }
 0x46d   :  { %v509_v4 = vor.u32 1.1754944e-38, %v508_v0  ;;  %vm507_vm10 = vcmp.eq.f32.partialorder %v506_v1, 8.507059e+37 }
 0x471   :  { %v1540_v59 = vpop.eup %1539 }
 0x472   :  { %v498_v60 = vmul.f32 %v1540_v59, %v495_v58  ;;  %vm503_vm6 = vweird.f32 %v1540_v59 }
 0x473   :  { %vm504_vm9 = vmor %vm502_vm7, %vm503_vm6 }
 0x474   :  { %v499_v61 = vsub.f32 1.0, %v498_v60 }
 0x476   :  { %v500_v62 = vmul.f32 %v1540_v59, %v499_v61 }
 0x478   :  { %v501_v63 = vadd.f32 %v1540_v59, %v500_v62 }
 0x47a   :  { %v505_v2 = vsel %vm504_vm9, %v1540_v59, %v501_v63 }
 0x47b   :  { %v510_v6 = vsel %vm507_vm10, %v509_v4, %v505_v2 }
 0x47c   :  { %v532_v9 = vmul.f32 %v530_v8, %v510_v6 }
 0x4d9   :  { %v535_v5 = vpop.permute.xlu1 %534 }
 0x4da   :  { %v537_v7 = vmul.f32 %v535_v5, %v510_v6 }
 0x4dc   :  { %539 = vrot.lane.b32.xlu0 %v537_v7, %s1662_s11 }
 0x54e   :  { %v540_v11 = vpop.permute.xlu0 %539 }
 0x54f   :  { %v542_v12 = vadd.f32 %v540_v11, %v532_v9 }
 0x551   :  { %1541 = vtanh.f32 %v542_v12  ;;  %553 = vrot.lane.b32.xlu2 %v542_v12, %s1662_s11 }
 0x552   :  { %1543 = vpow2.f32 %v1444_v14 }
 0x557   :  { %v1542_v13 = vpop.eup %1541 }
 0x558   :  { %545 = vrot.lane.b32.xlu1 %v1542_v13, %s1662_s11  ;;  %v1544_v15 = vpop.eup %1543 }
 0x559   :  { %v496_v21 = vadd.f32 1.0, %v1544_v15 }
 0x55b   :  { %1545 = vrcp.f32 %v496_v21  ;;  %v523_v31 = vand.u32 2147483648, %v496_v21  ;;  %vm517_vm14 = vweird.f32 %v496_v21  ;;  %v521_v32 = vand.u32 2147483647, %v496_v21 }
 0x55d   :  { %v524_v41 = vor.u32 1.1754944e-38, %v523_v31  ;;  %vm522_vm1 = vcmp.eq.f32.partialorder %v521_v32, 8.507059e+37 }
 0x561   :  { %v1546_v25 = vpop.eup %1545 }
 0x562   :  { %v513_v27 = vmul.f32 %v1546_v25, %v496_v21  ;;  %vm518_vm13 = vweird.f32 %v1546_v25  ;;  %v1477_v21 = vld [vmem:[%s2191_s2 + $0x10] sm:$0xff] }
 0x563   :  { %vm519_vm15 = vmor %vm517_vm14, %vm518_vm13  ;;  %1400 = vmatmul.msk.bf16.gmra.mxu1 %vm97_vm0, %v1477_v21  ;;  %1395 = vmatmul.msk.bf16.gmra.mxu0 %vm97_vm0, %v1477_v21 }
 0x564   :  { %v514_v28 = vsub.f32 1.0, %v513_v27 }
 0x566   :  { %v515_v29 = vmul.f32 %v1546_v25, %v514_v28 }
 0x568   :  { %v516_v30 = vadd.f32 %v1546_v25, %v515_v29  ;;  %v1666_v29 = vmov 6  }
 0x56a   :  { %v520_v36 = vsel %vm519_vm15, %v1546_v25, %v516_v30  ;;  %v651_v30 = vsel %vm211_vm8, 3, %v1666_v29 }
 0x56b   :  { %v525_v43 = vsel %vm522_vm1, %v524_v41, %v520_v36  ;;  %vm652_vm6 = vcmp.lt.s32.totalorder %v651_v30, %v1878_v35 }
 0x5ab   :  { %v554_v23 = vpop.permute.xlu2 %553 }
 0x5ac   :  { %v1941_v24 = vsel %vm550_vm12, %v554_v23, %v454_v44 }
 0x5ad   :  { %631 = vrot.lane.b32.xlu1 %v1941_v24, %s1662_s11 }
 0x5ca   :  { %v546_v40 = vpop.permute.xlu1 %545 }
 0x5cb   :  { %v548_v44 = vmul.f32 %v546_v40, %v525_v43 }
 0x5cd   :  { %v1948_v45 = vsel %vm550_vm12, %v548_v44, %v1914_v42  ;;  %v163_v42 = vpop.f32.mrf.mxu1 }
 0x5ce   :  { %v559_v46 = vpack.c.bf16 %v1948_v45, %v1948_v45  ;;  %v164_v47 = vadd.f32 %v163_v42, %v1860_v39 }
 0x5d0   :  { %1445 = vmatmul.msk.bf16.vlgmr.msrb.gmra.mxu2 %vm254_vm11, %v559_v46  ;;  %1446 = vmatmul.msk.bf16.vlgmr.msrb.gmra.mxu3 %vm254_vm11, %v559_v46 }
 0x5d1   :  { %886 = vmatpush.bf16.msrb.mxu3 %v1728_v3  ;;  %873 = vmatpush.bf16.msrb.mxu2 %v1771_v20 }
 0x5d5   :  { %887 = vmatpush.bf16.msrb.mxu3 %v1746_v10  ;;  %874 = vmatpush.bf16.msrb.mxu2 %v1790_v26 }
 0x5d9   :  { %888 = vmatpush.bf16.msrb.mxu3 %v1778_v22  ;;  %875 = vmatpush.bf16.msrb.mxu2 %v1810_v34 }
 0x5dd   :  { %889 = vmatpush.bf16.msrb.mxu3 %v1807_v33  ;;  %876 = vmatpush.bf16.msrb.mxu2 %v1822_v37 }
 0x61f   :  { %v632_v9 = vpop.permute.xlu1 %631 }
 0x653   :  { %v572_v49 = vpop.f32.mrf.mxu2  ;;  %v585_v50 = vpop.f32.mrf.mxu3 }
 0x654   :  { %v590_v51 = vadd.f32 %v585_v50, %v164_v47  ;;  %v589_v56 = vadd.f32 %v572_v49, %v130_v55 }
 0x656   :  { %1547 = vtanh.f32 %v590_v51  ;;  %v1447_v57 = vmul.f32 -1.442695, %v589_v56  ;;  %v1448_v15 = vmul.f32 -1.442695, %v590_v51  ;;  %v132_v56 = vpop.f32.mrf.mxu0 }
 0x658   :  { %1549 = vpow2.f32 %v1447_v57  ;;  %v133_v57 = vadd.f32 %v132_v56, %v1864_v48 }
 0x65b   :  { %v574_v52 = vpop.f32.mrf.mxu2  ;;  %v587_v53 = vpop.f32.mrf.mxu3 }
 0x65c   :  { %v1548_v54 = vpop.eup %1547 }
 0x65d   :  { %636 = vrot.lane.b32.xlu0 %v1548_v54, %s1662_s11 }
 0x65e   :  { %v1550_v58 = vpop.eup %1549 }
 0x65f   :  { %v597_v59 = vadd.f32 1.0, %v1550_v58 }
 0x661   :  { %1551 = vrcp.f32 %v597_v59  ;;  %v610_v1 = vand.u32 2147483648, %v597_v59  ;;  %vm604_vm3 = vweird.f32 %v597_v59  ;;  %v608_v2 = vand.u32 2147483647, %v597_v59 }
 0x663   :  { %v611_v5 = vor.u32 1.1754944e-38, %v610_v1  ;;  %vm609_vm5 = vcmp.eq.f32.partialorder %v608_v2, 8.507059e+37 }
 0x667   :  { %v1552_v60 = vpop.eup %1551 }
 0x668   :  { %v600_v61 = vmul.f32 %v1552_v60, %v597_v59  ;;  %vm605_vm2 = vweird.f32 %v1552_v60 }
 0x669   :  { %vm606_vm4 = vmor %vm604_vm3, %vm605_vm2 }
 0x66a   :  { %v601_v62 = vsub.f32 1.0, %v600_v61 }
 0x66c   :  { %v602_v63 = vmul.f32 %v1552_v60, %v601_v62 }
 0x66e   :  { %v603_v0 = vadd.f32 %v1552_v60, %v602_v63 }
 0x670   :  { %v607_v4 = vsel %vm606_vm4, %v1552_v60, %v603_v0 }
 0x671   :  { %v612_v7 = vsel %vm609_vm5, %v611_v5, %v607_v4 }
 0x672   :  { %v634_v11 = vmul.f32 %v632_v9, %v612_v7 }
 0x6cf   :  { %v637_v6 = vpop.permute.xlu0 %636 }
 0x6d0   :  { %v639_v8 = vmul.f32 %v637_v6, %v612_v7 }
 0x6d2   :  { %641 = vrot.lane.b32.xlu2 %v639_v8, %s1662_s11 }
 0x72c   :  { %v642_v12 = vpop.permute.xlu2 %641 }
 0x72d   :  { %v644_v13 = vadd.f32 %v642_v12, %v634_v11  ;;  %v1478_v12 = vld [vmem:[%s2191_s2 + $0x18] sm:$0xff] }
 0x72e   :  { %1401 = vmatmul.msk.bf16.gmra.mxu1 %vm97_vm0, %v1478_v12  ;;  %1396 = vmatmul.msk.bf16.gmra.mxu0 %vm97_vm0, %v1478_v12 }
 0x72f   :  { %1553 = vtanh.f32 %v644_v13  ;;  %655 = vrot.lane.b32.xlu1 %v644_v13, %s1662_s11  ;;  %v1479_v13 = vld [vmem:[%s2191_s2 + $0x20] sm:$0xff] }
 0x730   :  { %1555 = vpow2.f32 %v1448_v15 }
 0x735   :  { %v1554_v14 = vpop.eup %1553 }
 0x736   :  { %647 = vrot.lane.b32.xlu0 %v1554_v14, %s1662_s11  ;;  %v1556_v16 = vpop.eup %1555 }
 0x737   :  { %v598_v17 = vadd.f32 1.0, %v1556_v16 }
 0x739   :  { %1557 = vrcp.f32 %v598_v17  ;;  %v625_v41 = vand.u32 2147483648, %v598_v17  ;;  %vm619_vm9 = vweird.f32 %v598_v17  ;;  %v623_v43 = vand.u32 2147483647, %v598_v17 }
 0x73b   :  { %v626_v44 = vor.u32 1.1754944e-38, %v625_v41  ;;  %vm624_vm12 = vcmp.eq.f32.partialorder %v623_v43, 8.507059e+37 }
 0x73e   :  { %1402 = vmatmul.msk.bf16.gmra.mxu1 %vm97_vm0, %v1479_v13  ;;  %1397 = vmatmul.msk.bf16.gmra.mxu0 %vm97_vm0, %v1479_v13 }
 0x73f   :  { %v1558_v23 = vpop.eup %1557 }
 0x740   :  { %v615_v25 = vmul.f32 %v1558_v23, %v598_v17  ;;  %vm620_vm7 = vweird.f32 %v1558_v23 }
 0x741   :  { %vm621_vm10 = vmor %vm619_vm9, %vm620_vm7 }
 0x742   :  { %v616_v27 = vsub.f32 1.0, %v615_v25 }
 0x744   :  { %v617_v28 = vmul.f32 %v1558_v23, %v616_v27 }
 0x746   :  { %v618_v32 = vadd.f32 %v1558_v23, %v617_v28 }
 0x748   :  { %v622_v40 = vsel %vm621_vm10, %v1558_v23, %v618_v32 }
 0x749   :  { %v627_v46 = vsel %vm624_vm12, %v626_v44, %v622_v40 }
 0x7a1   :  { %v656_v31 = vpop.permute.xlu1 %655 }
 0x7a2   :  { %v1977_v36 = vsel %vm652_vm6, %v656_v31, %v1941_v24 }
 0x7a3   :  { %733 = vrot.lane.b32.xlu0 %v1977_v36, %s1662_s11 }
 0x7a8   :  { %v648_v42 = vpop.permute.xlu0 %647 }
 0x7a9   :  { %v650_v47 = vmul.f32 %v648_v42, %v627_v46  ;;  %v1667_v46 = vmov 5  }
 0x7aa   :  { %v753_v42 = vsel %vm211_vm8, 4, %v1667_v46 }
 0x7ab   :  { %v1982_v49 = vsel %vm652_vm6, %v650_v47, %v1948_v45  ;;  %v166_v45 = vpop.f32.mrf.mxu1  ;;  %vm754_vm5 = vcmp.lt.s32.totalorder %v753_v42, %v1878_v35 }
 0x7ac   :  { %v661_v24 = vpack.c.bf16 %v1982_v49, %v1982_v49  ;;  %v167_v50 = vadd.f32 %v166_v45, %v1860_v39 }
 0x7ae   :  { %1449 = vmatmul.msk.bf16.vlgmr.msra.gmra.mxu2 %vm254_vm11, %v661_v24  ;;  %1450 = vmatmul.msk.bf16.vlgmr.msra.gmra.mxu3 %vm254_vm11, %v661_v24 }
 0x7af   :  { %1090 = vmatpush.bf16.msra.mxu3 %v1728_v3  ;;  %1077 = vmatpush.bf16.msra.mxu2 %v1771_v20 }
 0x7b3   :  { %1091 = vmatpush.bf16.msra.mxu3 %v1746_v10  ;;  %1078 = vmatpush.bf16.msra.mxu2 %v1790_v26 }
 0x7b7   :  { %1092 = vmatpush.bf16.msra.mxu3 %v1778_v22  ;;  %1079 = vmatpush.bf16.msra.mxu2 %v1810_v34 }
 0x7bb   :  { %1093 = vmatpush.bf16.msra.mxu3 %v1807_v33  ;;  %1080 = vmatpush.bf16.msra.mxu2 %v1822_v37 }
 0x815   :  { %v734_v14 = vpop.permute.xlu0 %733 }
 0x831   :  { %v674_v51 = vpop.f32.mrf.mxu2  ;;  %v687_v52 = vpop.f32.mrf.mxu3 }
 0x832   :  { %v692_v53 = vadd.f32 %v687_v52, %v167_v50  ;;  %v691_v58 = vadd.f32 %v674_v51, %v133_v57 }
 0x834   :  { %1559 = vtanh.f32 %v692_v53  ;;  %v1451_v59 = vmul.f32 -1.442695, %v691_v58  ;;  %v1452_v23 = vmul.f32 -1.442695, %v692_v53 }
 0x836   :  { %1561 = vpow2.f32 %v1451_v59 }
 0x839   :  { %v676_v54 = vpop.f32.mrf.mxu2  ;;  %v689_v38 = vpop.f32.mrf.mxu3 }
 0x83a   :  { %v1560_v55 = vpop.eup %1559 }
 0x83b   :  { %738 = vrot.lane.b32.xlu2 %v1560_v55, %s1662_s11 }
 0x83c   :  { %v1562_v60 = vpop.eup %1561 }
 0x83d   :  { %v699_v61 = vadd.f32 1.0, %v1562_v60 }
 0x83f   :  { %1563 = vrcp.f32 %v699_v61  ;;  %v712_v4 = vand.u32 2147483648, %v699_v61  ;;  %vm706_vm14 = vweird.f32 %v699_v61  ;;  %v710_v5 = vand.u32 2147483647, %v699_v61 }
 0x841   :  { %v713_v7 = vor.u32 1.1754944e-38, %v712_v4  ;;  %vm711_vm1 = vcmp.eq.f32.partialorder %v710_v5, 8.507059e+37 }
 0x845   :  { %v1564_v62 = vpop.eup %1563 }
 0x846   :  { %v702_v63 = vmul.f32 %v1564_v62, %v699_v61  ;;  %vm707_vm13 = vweird.f32 %v1564_v62 }
 0x847   :  { %vm708_vm15 = vmor %vm706_vm14, %vm707_vm13 }
 0x848   :  { %v703_v0 = vsub.f32 1.0, %v702_v63 }
 0x84a   :  { %v704_v1 = vmul.f32 %v1564_v62, %v703_v0 }
 0x84c   :  { %v705_v2 = vadd.f32 %v1564_v62, %v704_v1 }
 0x84e   :  { %v709_v6 = vsel %vm708_vm15, %v1564_v62, %v705_v2 }
 0x84f   :  { %v714_v9 = vsel %vm711_vm1, %v713_v7, %v709_v6 }
 0x850   :  { %v736_v15 = vmul.f32 %v734_v14, %v714_v9 }
 0x895   :  { %v739_v8 = vpop.permute.xlu2 %738 }
 0x896   :  { %v741_v11 = vmul.f32 %v739_v8, %v714_v9 }
 0x898   :  { %743 = vrot.lane.b32.xlu1 %v741_v11, %s1662_s11 }
 0x90a   :  { %v744_v16 = vpop.permute.xlu1 %743 }
 0x90b   :  { %v746_v17 = vadd.f32 %v744_v16, %v736_v15 }
 0x90d   :  { %1565 = vtanh.f32 %v746_v17  ;;  %757 = vrot.lane.b32.xlu0 %v746_v17, %s1662_s11 }
 0x90e   :  { %1567 = vpow2.f32 %v1452_v23 }
 0x913   :  { %v1566_v21 = vpop.eup %1565 }
 0x914   :  { %749 = vrot.lane.b32.xlu2 %v1566_v21, %s1662_s11  ;;  %v1568_v25 = vpop.eup %1567 }
 0x915   :  { %v700_v27 = vadd.f32 1.0, %v1568_v25 }
 0x917   :  { %1569 = vrcp.f32 %v700_v27  ;;  %v727_v41 = vand.u32 2147483648, %v700_v27  ;;  %vm721_vm2 = vweird.f32 %v700_v27  ;;  %v725_v43 = vand.u32 2147483647, %v700_v27 }
 0x919   :  { %v728_v44 = vor.u32 1.1754944e-38, %v727_v41  ;;  %vm726_vm4 = vcmp.eq.f32.partialorder %v725_v43, 8.507059e+37 }
 0x91d   :  { %v1570_v28 = vpop.eup %1569 }
 0x91e   :  { %v717_v29 = vmul.f32 %v1570_v28, %v700_v27  ;;  %vm722_vm0 = vweird.f32 %v1570_v28 }
 0x91f   :  { %vm723_vm3 = vmor %vm721_vm2, %vm722_vm0 }
 0x920   :  { %v718_v30 = vsub.f32 1.0, %v717_v29 }
 0x922   :  { %v719_v31 = vmul.f32 %v1570_v28, %v718_v30 }
 0x924   :  { %v720_v32 = vadd.f32 %v1570_v28, %v719_v31 }
 0x926   :  { %v724_v40 = vsel %vm723_vm3, %v1570_v28, %v720_v32  ;;  %v1668_v28 = vmov 4  }
 0x927   :  { %v729_v47 = vsel %vm726_vm4, %v728_v44, %v724_v40  ;;  %v855_v29 = vsel %vm211_vm8, 5, %v1668_v28 }
 0x928   :  { %vm856_vm12 = vcmp.lt.s32.totalorder %v855_v29, %v1878_v35 }
 0x96e   :  { %v750_v24 = vpop.permute.xlu2 %749 }
 0x96f   :  { %v752_v45 = vmul.f32 %v750_v24, %v729_v47 }
 0x971   :  { %v2016_v50 = vsel %vm754_vm5, %v752_v45, %v1982_v49 }
 0x972   :  { %v763_v51 = vpack.c.bf16 %v2016_v50, %v2016_v50 }
 0x974   :  { %1453 = vmatmul.msk.bf16.vlgmr.msrb.gmra.mxu0 %vm254_vm11, %v763_v51  ;;  %1454 = vmatmul.msk.bf16.vlgmr.msrb.gmra.mxu1 %vm254_vm11, %v763_v51 }
 0x975   :  { %1192 = vmatpush.bf16.msrb.mxu1 %v1728_v3  ;;  %1179 = vmatpush.bf16.msrb.mxu0 %v1771_v20  ;;  %v134_v3 = vpop.f32.mrf.mxu0  ;;  %v168_v20 = vpop.f32.mrf.mxu1 }
 0x976   :  { %v135_v60 = vadd.f32 %v134_v3, %v1864_v48 }
 0x979   :  { %1193 = vmatpush.bf16.msrb.mxu1 %v1746_v10  ;;  %1180 = vmatpush.bf16.msrb.mxu0 %v1790_v26 }
 0x97d   :  { %1194 = vmatpush.bf16.msrb.mxu1 %v1778_v22  ;;  %1181 = vmatpush.bf16.msrb.mxu0 %v1810_v34  ;;  %v2035_v10 = vpop.f32.mrf.mxu0  ;;  %v2037_v26 = vpop.f32.mrf.mxu1 }
 0x97f   :  { %v758_v49 = vpop.permute.xlu0 %757 }
 0x980   :  { %v2029_v52 = vsel %vm754_vm5, %v758_v49, %v1977_v36 }
 0x981   :  { %835 = vrot.lane.b32.xlu2 %v2029_v52, %s1662_s11  ;;  %1195 = vmatpush.bf16.msrb.mxu1 %v1807_v33  ;;  %v169_v33 = vadd.f32 %v168_v20, %v1860_v39 }
 0x982   :  { %1182 = vmatpush.bf16.msrb.mxu0 %v1822_v37 }
 0x985   :  { %v2039_v22 = vpop.f32.mrf.mxu0  ;;  %v2041_v34 = vpop.f32.mrf.mxu1 }
 0x98d   :  { %v2043_v53 = vpop.f32.mrf.mxu0  ;;  %v2045_v36 = vpop.f32.mrf.mxu1 }
 0x995   :  { %v2047_v54 = vpop.f32.mrf.mxu0  ;;  %v2049_v38 = vpop.f32.mrf.mxu1 }
 0x9db   :  { %v836_v15 = vpop.permute.xlu2 %835 }
 0x9f1   :  { %v776_v37 = vpop.f32.mrf.mxu0  ;;  %v789_v55 = vpop.f32.mrf.mxu1 }
 0x9f2   :  { %v794_v56 = vadd.f32 %v789_v55, %v169_v33  ;;  %v793_v61 = vadd.f32 %v776_v37, %v135_v60  ;;  %v172_v33 = vadd.f32 %v2037_v26, %v1860_v39  ;;  %v138_v37 = vadd.f32 %v2035_v10, %v1864_v48 }
 0x9f4   :  { %1571 = vtanh.f32 %v794_v56  ;;  %v1455_v62 = vmul.f32 -1.442695, %v793_v61  ;;  %v1456_v25 = vmul.f32 -1.442695, %v794_v56 }
 0x9f6   :  { %1573 = vpow2.f32 %v1455_v62 }
 0x9f9   :  { %v778_v57 = vpop.f32.mrf.mxu0  ;;  %v791_v58 = vpop.f32.mrf.mxu1 }
 0x9fa   :  { %v1572_v59 = vpop.eup %1571 }
 0x9fb   :  { %840 = vrot.lane.b32.xlu1 %v1572_v59, %s1662_s11 }
 0x9fc   :  { %v1574_v63 = vpop.eup %1573 }
 0x9fd   :  { %v801_v0 = vadd.f32 1.0, %v1574_v63 }
 0x9ff   :  { %1575 = vrcp.f32 %v801_v0  ;;  %v814_v7 = vand.u32 2147483648, %v801_v0  ;;  %vm808_vm7 = vweird.f32 %v801_v0  ;;  %v812_v8 = vand.u32 2147483647, %v801_v0 }
 0xa01   :  { %v815_v11 = vor.u32 1.1754944e-38, %v814_v7  ;;  %vm813_vm10 = vcmp.eq.f32.partialorder %v812_v8, 8.507059e+37 }
 0xa05   :  { %v1576_v1 = vpop.eup %1575 }
 0xa06   :  { %v804_v2 = vmul.f32 %v1576_v1, %v801_v0  ;;  %vm809_vm6 = vweird.f32 %v1576_v1 }
 0xa07   :  { %vm810_vm9 = vmor %vm808_vm7, %vm809_vm6 }
 0xa08   :  { %v805_v4 = vsub.f32 1.0, %v804_v2 }
 0xa0a   :  { %v806_v5 = vmul.f32 %v1576_v1, %v805_v4 }
 0xa0c   :  { %v807_v6 = vadd.f32 %v1576_v1, %v806_v5 }
 0xa0e   :  { %v811_v9 = vsel %vm810_vm9, %v1576_v1, %v807_v6 }
 0xa0f   :  { %v816_v13 = vsel %vm813_vm10, %v815_v11, %v811_v9 }
 0xa10   :  { %v838_v16 = vmul.f32 %v836_v15, %v816_v13 }
 0xa6d   :  { %v841_v12 = vpop.permute.xlu1 %840 }
 0xa6e   :  { %v843_v14 = vmul.f32 %v841_v12, %v816_v13 }
 0xa70   :  { %845 = vrot.lane.b32.xlu0 %v843_v14, %s1662_s11 }
 0xae2   :  { %v846_v17 = vpop.permute.xlu0 %845 }
 0xae3   :  { %v848_v21 = vadd.f32 %v846_v17, %v838_v16 }
 0xae5   :  { %1577 = vtanh.f32 %v848_v21  ;;  %859 = vrot.lane.b32.xlu2 %v848_v21, %s1662_s11 }
 0xae6   :  { %1579 = vpow2.f32 %v1456_v25 }
 0xaeb   :  { %v1578_v23 = vpop.eup %1577 }
 0xaec   :  { %851 = vrot.lane.b32.xlu1 %v1578_v23, %s1662_s11  ;;  %v1580_v27 = vpop.eup %1579 }
 0xaed   :  { %v802_v30 = vadd.f32 1.0, %v1580_v27 }
 0xaef   :  { %1581 = vrcp.f32 %v802_v30  ;;  %v829_v42 = vand.u32 2147483648, %v802_v30  ;;  %vm823_vm14 = vweird.f32 %v802_v30  ;;  %v827_v47 = vand.u32 2147483647, %v802_v30 }
 0xaf1   :  { %v830_v45 = vor.u32 1.1754944e-38, %v829_v42  ;;  %vm828_vm1 = vcmp.eq.f32.partialorder %v827_v47, 8.507059e+37 }
 0xaf5   :  { %v1582_v41 = vpop.eup %1581 }
 0xaf6   :  { %v819_v43 = vmul.f32 %v1582_v41, %v802_v30  ;;  %vm824_vm13 = vweird.f32 %v1582_v41  ;;  %v1669_v30 = vmov 3  }
 0xaf7   :  { %vm825_vm15 = vmor %vm823_vm14, %vm824_vm13 }
 0xaf8   :  { %v820_v40 = vsub.f32 1.0, %v819_v43 }
 0xafa   :  { %v821_v44 = vmul.f32 %v1582_v41, %v820_v40 }
 0xafc   :  { %v822_v46 = vadd.f32 %v1582_v41, %v821_v44 }
 0xafe   :  { %v826_v24 = vsel %vm825_vm15, %v1582_v41, %v822_v46 }
 0xaff   :  { %v831_v51 = vsel %vm828_vm1, %v830_v45, %v826_v24 }
 0xb3f   :  { %v860_v31 = vpop.permute.xlu2 %859 }
 0xb40   :  { %v2063_v32 = vsel %vm856_vm12, %v860_v31, %v2029_v52  ;;  %v957_v31 = vsel %vm211_vm8, 6, %v1669_v30  ;;  %v1670_v30 = vmov 2  }
 0xb41   :  { %937 = vrot.lane.b32.xlu1 %v2063_v32, %s1662_s11  ;;  %vm958_vm5 = vcmp.lt.s32.totalorder %v957_v31, %v1878_v35  ;;  %v1059_v31 = vsel %vm211_vm8, 7, %v1670_v30 }
 0xb5e   :  { %v852_v49 = vpop.permute.xlu1 %851 }
 0xb5f   :  { %v854_v52 = vmul.f32 %v852_v49, %v831_v51 }
 0xb61   :  { %v2070_v3 = vsel %vm856_vm12, %v854_v52, %v2016_v50  ;;  %v174_v52 = vadd.f32 %v2041_v34, %v1860_v39 }
 0xb62   :  { %v865_v20 = vpack.c.bf16 %v2070_v3, %v2070_v3 }
 0xb64   :  { %1457 = vmatmul.msk.bf16.vlgmr.msrb.gmra.mxu2 %vm254_vm11, %v865_v20  ;;  %1458 = vmatmul.msk.bf16.vlgmr.msrb.gmra.mxu3 %vm254_vm11, %v865_v20  ;;  %v140_v20 = vadd.f32 %v2039_v22, %v1864_v48 }
 0xbb3   :  { %v938_v12 = vpop.permute.xlu1 %937 }
 0xbe7   :  { %v878_v55 = vpop.f32.mrf.mxu2  ;;  %v891_v56 = vpop.f32.mrf.mxu3 }
 0xbe8   :  { %v895_v57 = vadd.f32 %v878_v55, %v138_v37  ;;  %v896_v58 = vadd.f32 %v891_v56, %v172_v33 }
 0xbea   :  { %1583 = vtanh.f32 %v896_v58  ;;  %v1459_v61 = vmul.f32 -1.442695, %v895_v57  ;;  %v1460_v17 = vmul.f32 -1.442695, %v896_v58 }
 0xbec   :  { %1585 = vpow2.f32 %v1459_v61 }
 0xbef   :  { %v880_v50 = vpop.f32.mrf.mxu2  ;;  %v893_v59 = vpop.f32.mrf.mxu3 }
 0xbf0   :  { %v1584_v60 = vpop.eup %1583 }
 0xbf1   :  { %942 = vrot.lane.b32.xlu0 %v1584_v60, %s1662_s11 }
 0xbf2   :  { %v1586_v62 = vpop.eup %1585 }
 0xbf3   :  { %v903_v63 = vadd.f32 1.0, %v1586_v62 }
 0xbf5   :  { %1587 = vrcp.f32 %v903_v63  ;;  %v916_v4 = vand.u32 2147483648, %v903_v63  ;;  %vm910_vm2 = vweird.f32 %v903_v63  ;;  %v914_v5 = vand.u32 2147483647, %v903_v63 }
 0xbf7   :  { %v917_v7 = vor.u32 1.1754944e-38, %v916_v4  ;;  %vm915_vm4 = vcmp.eq.f32.partialorder %v914_v5, 8.507059e+37 }
 0xbfb   :  { %v1588_v0 = vpop.eup %1587 }
 0xbfc   :  { %v906_v26 = vmul.f32 %v1588_v0, %v903_v63  ;;  %vm911_vm0 = vweird.f32 %v1588_v0 }
 0xbfd   :  { %vm912_vm3 = vmor %vm910_vm2, %vm911_vm0 }
 0xbfe   :  { %v907_v1 = vsub.f32 1.0, %v906_v26 }
 0xc00   :  { %v908_v2 = vmul.f32 %v1588_v0, %v907_v1 }
 0xc02   :  { %v909_v10 = vadd.f32 %v1588_v0, %v908_v2 }
 0xc04   :  { %v913_v6 = vsel %vm912_vm3, %v1588_v0, %v909_v10 }
 0xc05   :  { %v918_v9 = vsel %vm915_vm4, %v917_v7, %v913_v6  ;;  %vm1060_vm4 = vcmp.lt.s32.totalorder %v1059_v31, %v1878_v35 }
 0xc06   :  { %v940_v13 = vmul.f32 %v938_v12, %v918_v9 }
 0xc63   :  { %v943_v8 = vpop.permute.xlu0 %942 }
 0xc64   :  { %v945_v11 = vmul.f32 %v943_v8, %v918_v9 }
 0xc66   :  { %947 = vrot.lane.b32.xlu2 %v945_v11, %s1662_s11 }
 0xcc0   :  { %v948_v14 = vpop.permute.xlu2 %947 }
 0xcc1   :  { %v950_v15 = vadd.f32 %v948_v14, %v940_v13 }
 0xcc3   :  { %1589 = vtanh.f32 %v950_v15  ;;  %961 = vrot.lane.b32.xlu1 %v950_v15, %s1662_s11 }
 0xcc4   :  { %1591 = vpow2.f32 %v1460_v17 }
 0xcc9   :  { %v1590_v16 = vpop.eup %1589 }
 0xcca   :  { %953 = vrot.lane.b32.xlu0 %v1590_v16, %s1662_s11  ;;  %v1592_v21 = vpop.eup %1591 }
 0xccb   :  { %v904_v23 = vadd.f32 1.0, %v1592_v21 }
 0xccd   :  { %1593 = vrcp.f32 %v904_v23  ;;  %v931_v44 = vand.u32 2147483648, %v904_v23  ;;  %vm925_vm7 = vweird.f32 %v904_v23  ;;  %v929_v46 = vand.u32 2147483647, %v904_v23 }
 0xccf   :  { %v932_v47 = vor.u32 1.1754944e-38, %v931_v44  ;;  %vm930_vm10 = vcmp.eq.f32.partialorder %v929_v46, 8.507059e+37 }
 0xcd3   :  { %v1594_v25 = vpop.eup %1593 }
 0xcd4   :  { %v921_v27 = vmul.f32 %v1594_v25, %v904_v23  ;;  %vm926_vm6 = vweird.f32 %v1594_v25 }
 0xcd5   :  { %vm927_vm9 = vmor %vm925_vm7, %vm926_vm6 }
 0xcd6   :  { %v922_v28 = vsub.f32 1.0, %v921_v27 }
 0xcd8   :  { %v923_v29 = vmul.f32 %v1594_v25, %v922_v28 }
 0xcda   :  { %v924_v43 = vadd.f32 %v1594_v25, %v923_v29 }
 0xcdc   :  { %v928_v42 = vsel %vm927_vm9, %v1594_v25, %v924_v43 }
 0xcdd   :  { %v933_v24 = vsel %vm930_vm10, %v932_v47, %v928_v42 }
 0xd35   :  { %v962_v41 = vpop.permute.xlu1 %961 }
 0xd36   :  { %v2088_v40 = vsel %vm958_vm5, %v962_v41, %v2063_v32 }
 0xd37   :  { %1039 = vrot.lane.b32.xlu0 %v2088_v40, %s1662_s11 }
 0xd3c   :  { %v954_v45 = vpop.permute.xlu0 %953 }
 0xd3d   :  { %v956_v51 = vmul.f32 %v954_v45, %v933_v24  ;;  %v177_v45 = vadd.f32 %v2045_v36, %v1860_v39 }
 0xd3f   :  { %v2093_v49 = vsel %vm958_vm5, %v956_v51, %v2070_v3  ;;  %v143_v51 = vadd.f32 %v2043_v53, %v1864_v48 }
 0xd40   :  { %v967_v32 = vpack.c.bf16 %v2093_v49, %v2093_v49 }
 0xd42   :  { %1461 = vmatmul.msk.bf16.vlgmr.msra.gmra.mxu0 %vm254_vm11, %v967_v32  ;;  %1462 = vmatmul.msk.bf16.vlgmr.msra.gmra.mxu1 %vm254_vm11, %v967_v32 }
 0xda9   :  { %v1040_v6 = vpop.permute.xlu0 %1039 }
 0xdbf   :  { %v980_v33 = vpop.f32.mrf.mxu0  ;;  %v993_v37 = vpop.f32.mrf.mxu1 }
 0xdc0   :  { %v997_v55 = vadd.f32 %v980_v33, %v140_v20  ;;  %v998_v56 = vadd.f32 %v993_v37, %v174_v52 }
 0xdc2   :  { %1595 = vtanh.f32 %v998_v56  ;;  %v1463_v50 = vmul.f32 -1.442695, %v997_v55  ;;  %v1464_v12 = vmul.f32 -1.442695, %v998_v56 }
 0xdc4   :  { %1597 = vpow2.f32 %v1463_v50 }
 0xdc7   :  { %v982_v3 = vpop.f32.mrf.mxu0  ;;  %v995_v57 = vpop.f32.mrf.mxu1 }
 0xdc8   :  { %v1596_v58 = vpop.eup %1595 }
 0xdc9   :  { %1044 = vrot.lane.b32.xlu2 %v1596_v58, %s1662_s11 }
 0xdca   :  { %v1598_v59 = vpop.eup %1597 }
 0xdcb   :  { %v1005_v60 = vadd.f32 1.0, %v1598_v59 }
 0xdcd   :  { %1599 = vrcp.f32 %v1005_v60  ;;  %v1018_v0 = vand.u32 2147483648, %v1005_v60  ;;  %vm1012_vm13 = vweird.f32 %v1005_v60  ;;  %v1016_v26 = vand.u32 2147483647, %v1005_v60 }
 0xdcf   :  { %v1019_v2 = vor.u32 1.1754944e-38, %v1018_v0  ;;  %vm1017_vm15 = vcmp.eq.f32.partialorder %v1016_v26, 8.507059e+37 }
 0xdd3   :  { %v1600_v61 = vpop.eup %1599 }
 0xdd4   :  { %v1008_v34 = vmul.f32 %v1600_v61, %v1005_v60  ;;  %vm1013_vm12 = vweird.f32 %v1600_v61 }
 0xdd5   :  { %vm1014_vm14 = vmor %vm1012_vm13, %vm1013_vm12 }
 0xdd6   :  { %v1009_v62 = vsub.f32 1.0, %v1008_v34 }
 0xdd8   :  { %v1010_v63 = vmul.f32 %v1600_v61, %v1009_v62 }
 0xdda   :  { %v1011_v22 = vadd.f32 %v1600_v61, %v1010_v63 }
 0xddc   :  { %v1015_v1 = vsel %vm1014_vm14, %v1600_v61, %v1011_v22 }
 0xddd   :  { %v1020_v4 = vsel %vm1017_vm15, %v1019_v2, %v1015_v1 }
 0xdde   :  { %v1042_v7 = vmul.f32 %v1040_v6, %v1020_v4  ;;  %v1671_v6 = vmov 1  }
 0xe23   :  { %v1045_v10 = vpop.permute.xlu2 %1044 }
 0xe24   :  { %v1047_v5 = vmul.f32 %v1045_v10, %v1020_v4 }
 0xe26   :  { %1049 = vrot.lane.b32.xlu1 %v1047_v5, %s1662_s11 }
 0xe98   :  { %v1050_v8 = vpop.permute.xlu1 %1049 }
 0xe99   :  { %v1052_v9 = vadd.f32 %v1050_v8, %v1042_v7  ;;  %v1161_v7 = vsel %vm211_vm8, 8, %v1671_v6 }
 0xe9a   :  { %vm1162_vm10 = vcmp.lt.s32.totalorder %v1161_v7, %v1878_v35 }
 0xe9b   :  { %1601 = vtanh.f32 %v1052_v9  ;;  %1063 = vrot.lane.b32.xlu0 %v1052_v9, %s1662_s11 }
 0xe9c   :  { %1603 = vpow2.f32 %v1464_v12 }
 0xea1   :  { %v1602_v11 = vpop.eup %1601 }
 0xea2   :  { %1055 = vrot.lane.b32.xlu2 %v1602_v11, %s1662_s11  ;;  %v1604_v13 = vpop.eup %1603 }
 0xea3   :  { %v1006_v14 = vadd.f32 1.0, %v1604_v13 }
 0xea5   :  { %1605 = vrcp.f32 %v1006_v14  ;;  %v1033_v25 = vand.u32 2147483648, %v1006_v14  ;;  %vm1027_vm0 = vweird.f32 %v1006_v14  ;;  %v1031_v27 = vand.u32 2147483647, %v1006_v14 }
 0xea7   :  { %v1034_v29 = vor.u32 1.1754944e-38, %v1033_v25  ;;  %vm1032_vm3 = vcmp.eq.f32.partialorder %v1031_v27, 8.507059e+37 }
 0xeab   :  { %v1606_v15 = vpop.eup %1605 }
 0xeac   :  { %v1023_v16 = vmul.f32 %v1606_v15, %v1006_v14  ;;  %vm1028_vm1 = vweird.f32 %v1606_v15 }
 0xead   :  { %vm1029_vm2 = vmor %vm1027_vm0, %vm1028_vm1 }
 0xeae   :  { %v1024_v17 = vsub.f32 1.0, %v1023_v16 }
 0xeb0   :  { %v1025_v21 = vmul.f32 %v1606_v15, %v1024_v17 }
 0xeb2   :  { %v1026_v23 = vadd.f32 %v1606_v15, %v1025_v21 }
 0xeb4   :  { %v1030_v28 = vsel %vm1029_vm2, %v1606_v15, %v1026_v23 }
 0xeb5   :  { %v1035_v41 = vsel %vm1032_vm3, %v1034_v29, %v1030_v28 }
 0xefc   :  { %v1056_v43 = vpop.permute.xlu2 %1055 }
 0xefd   :  { %v1058_v44 = vmul.f32 %v1056_v43, %v1035_v41  ;;  %v179_v41 = vadd.f32 %v2049_v38, %v1860_v39  ;;  %v145_v43 = vadd.f32 %v2047_v54, %v1864_v48 }
 0xeff   :  { %v2111_v46 = vsel %vm1060_vm4, %v1058_v44, %v2093_v49 }
 0xf00   :  { %v1069_v42 = vpack.c.bf16 %v2111_v46, %v2111_v46 }
 0xf02   :  { %1465 = vmatmul.msk.bf16.vlgmr.msra.gmra.mxu2 %vm254_vm11, %v1069_v42  ;;  %1466 = vmatmul.msk.bf16.vlgmr.msra.gmra.mxu3 %vm254_vm11, %v1069_v42 }
 0xf0d   :  { %v1064_v47 = vpop.permute.xlu0 %1063 }
 0xf0e   :  { %v1066_v24 = vsel %vm1060_vm4, %v1064_v47, %v2088_v40 }
 0xf0f   :  { %1141 = vrot.lane.b32.xlu2 %v1066_v24, %s1662_s11 }
 0xf69   :  { %v1142_v0 = vpop.permute.xlu2 %1141 }
 0xf85   :  { %v1082_v49 = vpop.f32.mrf.mxu2  ;;  %v1095_v32 = vpop.f32.mrf.mxu3 }
 0xf86   :  { %v1099_v52 = vadd.f32 %v1082_v49, %v143_v51  ;;  %v1100_v20 = vadd.f32 %v1095_v32, %v177_v45 }
 0xf88   :  { %1607 = vtanh.f32 %v1100_v20  ;;  %v1467_v56 = vmul.f32 -1.442695, %v1099_v52  ;;  %v1468_v4 = vmul.f32 -1.442695, %v1100_v20 }
 0xf8a   :  { %1609 = vpow2.f32 %v1467_v56 }
 0xf8d   :  { %v1084_v33 = vpop.f32.mrf.mxu2  ;;  %v1097_v37 = vpop.f32.mrf.mxu3 }
 0xf8e   :  { %v1608_v55 = vpop.eup %1607 }
 0xf8f   :  { %1146 = vrot.lane.b32.xlu1 %v1608_v55, %s1662_s11 }
 0xf90   :  { %v1610_v40 = vpop.eup %1609 }
 0xf91   :  { %v1107_v3 = vadd.f32 1.0, %v1610_v40 }
 0xf93   :  { %1611 = vrcp.f32 %v1107_v3  ;;  %v1120_v59 = vand.u32 2147483648, %v1107_v3  ;;  %vm1114_vm6 = vweird.f32 %v1107_v3  ;;  %v1118_v60 = vand.u32 2147483647, %v1107_v3 }
 0xf95   :  { %v1121_v34 = vor.u32 1.1754944e-38, %v1120_v59  ;;  %vm1119_vm9 = vcmp.eq.f32.partialorder %v1118_v60, 8.507059e+37  ;;  %v1269_v59 = vld [vmem:[%s2195_s6 + $0x18] sm:$0xff]  ;;  %v1268_v60 = vld [vmem:[%s2195_s6 + $0x10] sm:$0xff] }
 0xf99   :  { %v1612_v57 = vpop.eup %1611 }
 0xf9a   :  { %v1110_v36 = vmul.f32 %v1612_v57, %v1107_v3  ;;  %vm1115_vm5 = vweird.f32 %v1612_v57 }
 0xf9b   :  { %vm1116_vm7 = vmor %vm1114_vm6, %vm1115_vm5 }
 0xf9c   :  { %v1111_v58 = vsub.f32 1.0, %v1110_v36  ;;  %v1273_v36 = vld [vmem:[%s2195_s6 + $0x38] sm:$0xff] }
 0xf9d   :  { %1289 = vmatpush.msrb.mxu2 %v1273_v36 }
 0xf9e   :  { %v1112_v50 = vmul.f32 %v1612_v57, %v1111_v58  ;;  %v1272_v58 = vld [vmem:[%s2195_s6 + $0x30] sm:$0xff] }
 0xf9f   :  { %1290 = vmatpush.msrb.mxu2 %v1272_v58 }
 0xfa0   :  { %v1113_v53 = vadd.f32 %v1612_v57, %v1112_v50  ;;  %v1271_v50 = vld [vmem:[%s2195_s6 + $0x28] sm:$0xff] }
 0xfa1   :  { %1291 = vmatpush.msrb.mxu2 %v1271_v50 }
 0xfa2   :  { %v1117_v61 = vsel %vm1116_vm7, %v1612_v57, %v1113_v53  ;;  %v1270_v53 = vld [vmem:[%s2195_s6 + $0x20] sm:$0xff] }
 0xfa3   :  { %v1122_v63 = vsel %vm1119_vm9, %v1121_v34, %v1117_v61  ;;  %1292 = vmatpush.msrb.mxu2 %v1270_v53  ;;  %v1267_v61 = vld [vmem:[%s2195_s6 + $0x8] sm:$0xff] }
 0xfa4   :  { %v1144_v26 = vmul.f32 %v1142_v0, %v1122_v63 }
 0xfa5   :  { %1293 = vmatpush.msrb.mxu2 %v1269_v59 }
 0xfa7   :  { %1294 = vmatpush.msrb.mxu2 %v1268_v60 }
 0xfa9   :  { %1295 = vmatpush.msrb.mxu2 %v1267_v61 }
0x1001   :  { %v1147_v62 = vpop.permute.xlu1 %1146 }
0x1002   :  { %v1149_v22 = vmul.f32 %v1147_v62, %v1122_v63 }
0x1004   :  { %1151 = vrot.lane.b32.xlu0 %v1149_v22, %s1662_s11 }
0x1076   :  { %v1152_v1 = vpop.permute.xlu0 %1151 }
0x1077   :  { %v1154_v2 = vadd.f32 %v1152_v1, %v1144_v26 }
0x1079   :  { %1613 = vtanh.f32 %v1154_v2  ;;  %1165 = vrot.lane.b32.xlu2 %v1154_v2, %s1662_s11 }
0x107a   :  { %1615 = vpow2.f32 %v1468_v4  ;;  %v1301_v4 = vld [vmem:[%s2190_s1] sm:$0xff] }
0x107f   :  { %v1614_v10 = vpop.eup %1613 }
0x1080   :  { %1157 = vrot.lane.b32.xlu1 %v1614_v10, %s1662_s11  ;;  %v1616_v5 = vpop.eup %1615  ;;  %v1266_v10 = vld [vmem:[%s2195_s6] sm:$0xff] }
0x1081   :  { %v1108_v8 = vadd.f32 1.0, %v1616_v5  ;;  %1296 = vmatpush.msrb.mxu2 %v1266_v10 }
0x1083   :  { %1617 = vrcp.f32 %v1108_v8  ;;  %v1135_v17 = vand.u32 2147483648, %v1108_v8  ;;  %vm1129_vm13 = vweird.f32 %v1108_v8  ;;  %v1133_v21 = vand.u32 2147483647, %v1108_v8 }
0x1085   :  { %v1136_v25 = vor.u32 1.1754944e-38, %v1135_v17  ;;  %vm1134_vm15 = vcmp.eq.f32.partialorder %v1133_v21, 8.507059e+37 }
0x1089   :  { %v1618_v12 = vpop.eup %1617 }
0x108a   :  { %v1125_v13 = vmul.f32 %v1618_v12, %v1108_v8  ;;  %vm1130_vm12 = vweird.f32 %v1618_v12 }
0x108b   :  { %vm1131_vm14 = vmor %vm1129_vm13, %vm1130_vm12  ;;  %vm1339_vm12 = vcmask 0  }
0x108c   :  { %v1126_v14 = vsub.f32 1.0, %v1125_v13 }
0x108e   :  { %v1127_v15 = vmul.f32 %v1618_v12, %v1126_v14 }
0x1090   :  { %v1128_v16 = vadd.f32 %v1618_v12, %v1127_v15  ;;  %v1263_v15 = vsel %vm211_vm8, 9, %v1661_v18  ;;  %vm1308_vm8 = vcmask 15360  }
0x1091   :  { %vm1264_vm9 = vcmp.lt.s32.totalorder %v1263_v15, %v1878_v35 }
0x1092   :  { %v1132_v23 = vsel %vm1131_vm14, %v1618_v12, %v1128_v16 }
0x1093   :  { %v1137_v27 = vsel %vm1134_vm15, %v1136_v25, %v1132_v23 }
0x10d3   :  { %v1166_v9 = vpop.permute.xlu2 %1165 }
0x10d4   :  { %v1168_v11 = vsel %vm1162_vm10, %v1166_v9, %v1066_v24 }
0x10d5   :  { %1243 = vrot.lane.b32.xlu1 %v1168_v11, %s1662_s11 }
0x10f2   :  { %v1158_v28 = vpop.permute.xlu1 %1157 }
0x10f3   :  { %v1160_v29 = vmul.f32 %v1158_v28, %v1137_v27  ;;  %v1510_v27 = vld [vmem:[%s2196_s7] ss:$0 sm:$0xff]  ;;  %v1672_v28 = vmov 0.0   ;;  %s1673_s7 = smov [#allocation3]  }
0x10f5   :  { %v2136_v30 = vsel %vm1162_vm10, %v1160_v29, %v2111_v46 }
0x10f6   :  { %v1171_v31 = vpack.c.bf16 %v2136_v30, %v2136_v30 }
0x10f8   :  { %1469 = vmatmul.msk.bf16.vlgmr.msrb.gmra.mxu0 %vm254_vm11, %v1171_v31  ;;  %1470 = vmatmul.msk.bf16.vlgmr.msrb.gmra.mxu1 %vm254_vm11, %v1171_v31 }
0x1147   :  { %v1244_v34 = vpop.permute.xlu1 %1243 }
0x1175   :  { %v1184_v44 = vpop.f32.mrf.mxu0  ;;  %v1197_v42 = vpop.f32.mrf.mxu1 }
0x1176   :  { %v1201_v47 = vadd.f32 %v1184_v44, %v145_v43  ;;  %v1202_v24 = vadd.f32 %v1197_v42, %v179_v41 }
0x1178   :  { %1619 = vtanh.f32 %v1202_v24  ;;  %v1471_v49 = vmul.f32 -1.442695, %v1201_v47  ;;  %v1472_v26 = vmul.f32 -1.442695, %v1202_v24 }
0x117a   :  { %1621 = vpow2.f32 %v1471_v49 }
0x117d   :  { %v1186_v46 = vpop.f32.mrf.mxu0  ;;  %v1199_v45 = vpop.f32.mrf.mxu1 }
0x117e   :  { %v1620_v51 = vpop.eup %1619 }
0x117f   :  { %1248 = vrot.lane.b32.xlu0 %v1620_v51, %s1662_s11 }
0x1180   :  { %v1622_v32 = vpop.eup %1621 }
0x1181   :  { %v1209_v52 = vadd.f32 1.0, %v1622_v32 }
0x1183   :  { %1623 = vrcp.f32 %v1209_v52  ;;  %v1222_v54 = vand.u32 2147483648, %v1209_v52  ;;  %vm1216_vm0 = vweird.f32 %v1209_v52  ;;  %v1220_v37 = vand.u32 2147483647, %v1209_v52 }
0x1185   :  { %v1223_v56 = vor.u32 1.1754944e-38, %v1222_v54  ;;  %vm1221_vm3 = vcmp.eq.f32.partialorder %v1220_v37, 8.507059e+37 }
0x1189   :  { %v1624_v20 = vpop.eup %1623 }
0x118a   :  { %v1212_v39 = vmul.f32 %v1624_v20, %v1209_v52  ;;  %vm1217_vm1 = vweird.f32 %v1624_v20 }
0x118b   :  { %vm1218_vm2 = vmor %vm1216_vm0, %vm1217_vm1 }
0x118c   :  { %v1213_v38 = vsub.f32 1.0, %v1212_v39 }
0x118e   :  { %v1214_v33 = vmul.f32 %v1624_v20, %v1213_v38 }
0x1190   :  { %v1215_v48 = vadd.f32 %v1624_v20, %v1214_v33 }
0x1192   :  { %v1219_v55 = vsel %vm1218_vm2, %v1624_v20, %v1215_v48 }
0x1193   :  { %v1224_v3 = vsel %vm1221_vm3, %v1223_v56, %v1219_v55 }
0x1194   :  { %v1246_v62 = vmul.f32 %v1244_v34, %v1224_v3 }
0x11f1   :  { %v1249_v40 = vpop.permute.xlu0 %1248 }
0x11f2   :  { %v1251_v57 = vmul.f32 %v1249_v40, %v1224_v3 }
0x11f4   :  { %1253 = vrot.lane.b32.xlu2 %v1251_v57, %s1662_s11 }
0x11fc   :  { %1303 = vperm.xlu2 %1508, %v1301_v4  }
0x124e   :  { %v1254_v63 = vpop.permute.xlu2 %1253 }
0x124f   :  { %v1256_v22 = vadd.f32 %v1254_v63, %v1246_v62 }
0x1251   :  { %1625 = vtanh.f32 %v1256_v22 }
0x1252   :  { %1627 = vpow2.f32 %v1472_v26 }
0x1256   :  { %v1304_v25 = vpop.permute.xlu2 %1303 }
0x1257   :  { %v1626_v0 = vpop.eup %1625  ;;  %vm1305_vm10 = vcmp.eq.s32.totalorder %v1873_v19, %v1304_v25 }
0x1258   :  { %1259 = vrot.lane.b32.xlu0 %v1626_v0, %s1662_s11  ;;  %v1628_v1 = vpop.eup %1627  ;;  %v1474_v29 = vsel %vm1305_vm10, 1.0, %v1672_v28  ;;  %s1346_s11 = sshll.u32 %s1673_s7, 4  ;;  %s1347_s11 = int_to_ptr.vmem [resolvable:$true] %s1346_s11 }
0x1259   :  { %v1210_v2 = vadd.f32 1.0, %v1628_v1 }
0x125b   :  { %1629 = vrcp.f32 %v1210_v2  ;;  %v1237_v11 = vand.u32 2147483648, %v1210_v2  ;;  %vm1231_vm5 = vweird.f32 %v1210_v2  ;;  %v1235_v12 = vand.u32 2147483647, %v1210_v2 }
0x125d   :  { %v1238_v14 = vor.u32 1.1754944e-38, %v1237_v11  ;;  %vm1236_vm7 = vcmp.eq.f32.partialorder %v1235_v12, 8.507059e+37 }
0x1261   :  { %v1630_v5 = vpop.eup %1629 }
0x1262   :  { %v1227_v6 = vmul.f32 %v1630_v5, %v1210_v2  ;;  %vm1232_vm4 = vweird.f32 %v1630_v5 }
0x1263   :  { %vm1233_vm6 = vmor %vm1231_vm5, %vm1232_vm4 }
0x1264   :  { %v1228_v7 = vsub.f32 1.0, %v1227_v6 }
0x1266   :  { %v1229_v8 = vmul.f32 %v1630_v5, %v1228_v7 }
0x1268   :  { %v1230_v9 = vadd.f32 %v1630_v5, %v1229_v8 }
0x126a   :  { %v1234_v13 = vsel %vm1233_vm6, %v1630_v5, %v1230_v9 }
0x126b   :  { %v1239_v16 = vsel %vm1236_vm7, %v1238_v14, %v1234_v13 }
0x12ca   :  { %v1260_v17 = vpop.permute.xlu0 %1259 }
0x12cb   :  { %v1262_v21 = vmul.f32 %v1260_v17, %v1239_v16 }
0x12cd   :  { %v1265_v23 = vsel %vm1264_vm9, %v1262_v21, %v2136_v30 }
0x12ce   :  { %1473 = vmatmul.msk.f32.vlgmr.msrb.gmra.mxu2 %vm254_vm11, %v1265_v23  ;;  %vm1326_vm11 = vcmask 7168  }
0x1351   :  { %v1298_v31 = vpop.f32.mrf.mxu2 }
0x1352   :  { %v1299_v18 = vadd.f32 %v1510_v27, %v1298_v31 }
0x1354   :  { %v1309_v41 = vsel %vm1308_vm8, %v1299_v18, -inf  ;;  %v1321_v43 = vmul.f32 %v1474_v29, %v1299_v18 }
0x1355   :  { %1310 = vmax.xlane.f32.xlu1 %v1309_v41 }
0x1356   :  { %v1322_v35 = vsel %vm1308_vm8, %v1321_v43, 0.0 }
0x1357   :  { %1323 = vadd.xlane.f32.xlu2 %v1322_v35 }
0x13c8   :  { %v1311_v30 = vpop.xlane.xlu1 %1310 }
0x13c9   :  { %v1312_v44 = vsub.f32 %v1299_v18, %v1311_v30 }
0x13ca   :  { %v1324_v49 = vpop.xlane.xlu2 %1323 }
0x13cb   :  { %v1313_v42 = vmul.f32 1.442695, %v1312_v44 }
0x13cd   :  { %1631 = vpow2.f32 %v1313_v42 }
0x13d3   :  { %v1632_v47 = vpop.eup %1631 }
0x13d4   :  { %v1315_v19 = vsel %vm1308_vm8, %v1632_v47, 0.0 }
0x13d5   :  { %1316 = vadd.xlane.f32.xlu0 %v1315_v19 }
0x1448   :  { %v1317_v24 = vpop.xlane.xlu0 %1316 }
0x1449   :  { %1633 = vlog2.f32 %v1317_v24 }
0x144f   :  { %v1634_v46 = vpop.eup %1633 }
0x1450   :  { %v1319_v45 = vmul.f32 0.6931472, %v1634_v46 }
0x1452   :  { %v1320_v51 = vadd.f32 %v1319_v45, %v1311_v30 }
0x1454   :  { %v1325_v32 = vsub.f32 %v1320_v51, %v1324_v49 }
0x1456   :  { %v1327_v52 = vsel %vm1326_vm11, %v1325_v32, 0.0 }
0x1457   :  { %1328 = vadd.xlane.f32.xlu1 %v1327_v52 }
0x14ca   :  { %v1329_v20 = vpop.xlane.xlu1 %1328 }
0x14cb   :  { %v1330_v39 = vrot.slane %v1329_v20, 4 }
0x14cd   :  { %v1331_v38 = vadd.f32 %v1330_v39, %v1329_v20 }
0x14cf   :  { %v1332_v33 = vrot.slane %v1331_v38, 2 }
0x14d1   :  { %v1333_v48 = vadd.f32 %v1332_v33, %v1331_v38 }
0x14d3   :  { %v1334_v54 = vrot.slane %v1333_v48, 1 }
0x14d5   :  { %v1335_v37 = vadd.f32 %v1334_v54, %v1333_v48 }
0x14d7   :  { %1492 = vpush %v1335_v37 }
0x1508   :  { %s1493_s15 = spop %1492 }
0x1509   :  { %s1337_s16 = smul.f32 0.125, %s1493_s15 }
0x150b   :  { %v1338_v55 = vstv %s1337_s16 }
0x150c   :  { %1340 = vst.msk [vmem:[#allocation3] sm:$0x1] %vm1339_vm12, %v1338_v55 }
0x150d   :  { %1351 = dma.vmem_to_hbm [thread:$0]  %s1347_s11, 16, %s1349_s14, [#allocation4]  }
0x150e   :  { %1659 = dma.done.wait [#allocation4], 16  }
0x150f   :  { %1660 = vsyncadd [#allocation4], 4294967280 }
0x1510   :  { %1356 = vsyncpa [#allocation4], 1 }

</bundles_post_ra>
